<compile_context>
chip_gen: v7x
topology: tpu7x:2x2x1
jax: 0.10.0
libtpu: 0.0.40
codegen_flags: <defaults>
</compile_context>

<pallas_src>
import functools

import jax
import jax.numpy as jnp
from jax.experimental import pallas as pl
from jax.experimental.pallas import tpu as pltpu


_SQRT_2_OVER_PI = 0.7978845608028654


def gelu_tanh(x):
    return 0.5 * x * (1.0 + jnp.tanh(_SQRT_2_OVER_PI * (x + 0.044715 * x * x * x)))


def _mm(a, b, dims, bf16):
    """dot_general with explicit contraction dims (no materialized transposes)."""
    if bf16:
        a = a.astype(jnp.bfloat16)
        b = b.astype(jnp.bfloat16)
    return jax.lax.dot_general(
        a, b, dimension_numbers=(dims, ((), ())),
        preferred_element_type=jnp.float32)


def _cross_transformer_kernel(
    s1_ref, s2_ref,
    wp_ref, bp_ref, g13_ref, b13_ref,
    wq_ref, bq_ref, wk_ref, bk_ref, wv_ref, bv_ref,
    wo_ref, bo_ref, g12_ref, b12_ref,
    w1_ref, b1_ref, w2_ref, b2_ref,
    out_ref,
    *, nhead, bf16,
):
    def layernorm_c(h, g, b):
        # LayerNorm over the channel (sublane) axis of a (C, N) tile; eps = 1e-5.
        inv_c = 1.0 / h.shape[0]
        mu = jnp.sum(h, axis=0, keepdims=True) * inv_c            # (1, N)
        d = h - mu
        var = jnp.sum(d * d, axis=0, keepdims=True) * inv_c       # (1, N)
        return d * jax.lax.rsqrt(var + 1e-5) * g + b

    wp, bp = wp_ref[...], bp_ref[...]
    g13, b13 = g13_ref[...], b13_ref[...]

    # input_proj (1x1 conv) + norm13, channel-major (C, N).
    s1 = layernorm_c(_mm(wp, s1_ref[0], ((1,), (0,)), bf16) + bp, g13, b13)   # (C, N1)
    s2 = layernorm_c(_mm(wp, s2_ref[0], ((1,), (0,)), bf16) + bp, g13, b13)   # (C, N2)

    # Multi-head attention: query from src1, key/value from src2.
    q = _mm(wq_ref[...], s1, ((1,), (0,)), bf16) + bq_ref[...]    # (C, N1)
    k = _mm(wk_ref[...], s2, ((1,), (0,)), bf16) + bk_ref[...]    # (C, N2)
    v = _mm(wv_ref[...], s2, ((1,), (0,)), bf16) + bv_ref[...]    # (C, N2)

    c = q.shape[0]
    hd = c // nhead
    scale = float(hd) ** -0.5
    head_outs = []
    for h in range(nhead):                   # static unroll; each head is a sublane slice
        lo, hi = h * hd, (h + 1) * hd
        qh = q[lo:hi, :] * scale             # (hd, N1)  (torch scales q after projection)
        kh = k[lo:hi, :]                     # (hd, N2)
        vh = v[lo:hi, :]                     # (hd, N2)
        # scores (N1, N2): contract head dim of q/k directly on the MXU.
        scores = _mm(qh, kh, ((0,), (0,)), bf16)
        m = jnp.max(scores, axis=-1, keepdims=True)
        e = jnp.exp(scores - m)
        p_attn = e * pl.reciprocal(jnp.sum(e, axis=-1, keepdims=True), approx=False)
        # (hd, N1): contract the key dim of v/attn -- no attn transpose materialized.
        head_outs.append(_mm(vh, p_attn, ((1,), (1,)), bf16))
    attn_out = jnp.concatenate(head_outs, axis=0)                 # (C, N1)
    mha = _mm(wo_ref[...], attn_out, ((1,), (0,)), bf16) + bo_ref[...]

    # residual + norm12  (dropout12 has p=0.0).
    r = layernorm_c(s1 + mha, g12_ref[...], b12_ref[...])

    # FFN: linear11 -> GELU -> linear12 (+ residual); dropout1/dropout13 have p=0.0.
    h1 = _mm(w1_ref[...], r, ((1,), (0,)), bf16) + b1_ref[...]                 # (dff, N1)
    h2 = _mm(w2_ref[...], gelu_tanh(h1), ((1,), (0,)), bf16) + b2_ref[...]     # (C, N1)

    # Output already in (C, N) layout -> final permute(1, 2, 0) is free.
    out_ref[0] = (r + h2).astype(out_ref.dtype)


def cross_transformer_pallas(src1, src2, params, *, nhead, use_bf16_matmul=False):
    B, d_in, n1 = src1.shape
    b2, d2, n2 = src2.shape
    assert b2 == B and d2 == d_in
    c = params["w_proj"].shape[0]

    col = lambda t: t.reshape(-1, 1).astype(jnp.float32)

    weights = (
        params["w_proj"], col(params["b_proj"]),
        col(params["g13"]), col(params["b13"]),
        params["wq"], col(params["bq"]),
        params["wk"], col(params["bk"]),
        params["wv"], col(params["bv"]),
        params["wo"], col(params["bo"]),
        col(params["g12"]), col(params["b12"]),
        params["w1"], col(params["b1"]),
        params["w2"], col(params["b2"]),
    )

    def whole(arr):  # full-array block, constant index map -> DMA'd once, reused per step
        nd = arr.ndim
        return pl.BlockSpec(arr.shape, lambda b, _nd=nd: (0,) * _nd)

    in_specs = (
        [pl.BlockSpec((1, d_in, n1), lambda b: (b, 0, 0)),
         pl.BlockSpec((1, d_in, n2), lambda b: (b, 0, 0))]
        + [whole(w) for w in weights]
    )

    kernel = functools.partial(
        _cross_transformer_kernel, nhead=nhead, bf16=use_bf16_matmul)

    return pl.pallas_call(
        kernel,
        out_shape=jax.ShapeDtypeStruct((B, c, n1), jnp.float32),
        grid_spec=pltpu.PrefetchScalarGridSpec(
            num_scalar_prefetch=0,
            grid=(B,),
            in_specs=in_specs,
            out_specs=pl.BlockSpec((1, c, n1), lambda b: (b, 0, 0)),
        ),
        compiler_params=pltpu.CompilerParams(
            dimension_semantics=("parallel",),   # shards batches over v7x's 2 TCs
        ),
    )(src1, src2, *weights)


def cross_transformer_ref(src1, src2, params, *, nhead):
    """Pure-JAX mirror of the PyTorch forward (dropout=0, tanh-GELU)."""
    p = params

    def conv1x1(x):
        return jnp.einsum("oc,bcn->bon", p["w_proj"], x) + p["b_proj"][None, :, None]

    def layernorm(x, g, b):  # over last dim, eps=1e-5
        mu = jnp.mean(x, axis=-1, keepdims=True)
        var = jnp.mean((x - mu) ** 2, axis=-1, keepdims=True)
        return (x - mu) / jnp.sqrt(var + 1e-5) * g + b

    s1 = jnp.transpose(conv1x1(src1), (2, 0, 1))   # (N1, B, C)
    s2 = jnp.transpose(conv1x1(src2), (2, 0, 1))   # (N2, B, C)
    s1 = layernorm(s1, p["g13"], p["b13"])
    s2 = layernorm(s2, p["g13"], p["b13"])

    L, B, C = s1.shape
    S = s2.shape[0]
    hd = C // nhead

    q = s1 @ p["wq"].T + p["bq"]
    k = s2 @ p["wk"].T + p["bk"]
    v = s2 @ p["wv"].T + p["bv"]

    def heads(x, T):
        return jnp.transpose(x.reshape(T, B, nhead, hd), (1, 2, 0, 3))  # (B, H, T, hd)

    qh = heads(q, L) * (float(hd) ** -0.5)
    kh = heads(k, S)
    vh = heads(v, S)
    attn = jax.nn.softmax(jnp.einsum("bhld,bhsd->bhls", qh, kh), axis=-1)
    o = jnp.einsum("bhls,bhsd->bhld", attn, vh)                     # (B, H, L, hd)
    o = jnp.transpose(o, (2, 0, 1, 3)).reshape(L, B, C)
    mha = o @ p["wo"].T + p["bo"]

    r = layernorm(s1 + mha, p["g12"], p["b12"])
    ff = gelu_tanh(r @ p["w1"].T + p["b1"]) @ p["w2"].T + p["b2"]
    out = r + ff
    return jnp.transpose(out, (1, 2, 0))                            # (B, C, N1)


def make_params(key, d_model, d_model_out, dim_feedforward):
    c, dff = d_model_out, dim_feedforward
    ks = jax.random.split(key, 18)
    s = 0.2
    rn = lambda k, shape: s * jax.random.normal(k, shape, jnp.float32)
    return {
        "w_proj": rn(ks[0], (c, d_model)), "b_proj": rn(ks[1], (c,)),
        "g13": 1.0 + 0.1 * jax.random.normal(ks[2], (c,), jnp.float32),
        "b13": 0.1 * jax.random.normal(ks[3], (c,), jnp.float32),
        "wq": rn(ks[4], (c, c)), "bq": rn(ks[5], (c,)),
        "wk": rn(ks[6], (c, c)), "bk": rn(ks[7], (c,)),
        "wv": rn(ks[8], (c, c)), "bv": rn(ks[9], (c,)),
        "wo": rn(ks[10], (c, c)), "bo": rn(ks[11], (c,)),
        "g12": 1.0 + 0.1 * jax.random.normal(ks[12], (c,), jnp.float32),
        "b12": 0.1 * jax.random.normal(ks[13], (c,), jnp.float32),
        "w1": rn(ks[14], (dff, c)), "b1": rn(ks[15], (dff,)),
        "w2": rn(ks[16], (c, dff)), "b2": rn(ks[17], (c,)),
    }


if __name__ == "__main__":
    # Small shapes consistent with the module: d_model=64 -> d_model_out=32, 4 heads
    # (head_dim=8), dim_feedforward=64, batch=2, seq=16.
    B, d_model, d_model_out, nhead, dff = 2, 64, 32, 4, 64
    N1, N2 = 16, 16

    key = jax.random.PRNGKey(0)
    k1, k2, kp = jax.random.split(key, 3)
    src1 = jax.random.normal(k1, (B, d_model, N1), jnp.float32)
    src2 = jax.random.normal(k2, (B, d_model, N2), jnp.float32)
    params = make_params(kp, d_model, d_model_out, dff)

    out = cross_transformer_pallas(src1, src2, params, nhead=nhead)
    out = jax.block_until_ready(out)

    ref = cross_transformer_ref(src1, src2, params, nhead=nhead)
    assert out.shape == (B, d_model_out, N1)
    max_err = float(jnp.max(jnp.abs(out - ref)))
    assert jnp.allclose(out, ref, atol=1e-4, rtol=1e-4), max_err
    print("KERNEL_OK")
</pallas_src>

<mosaic_0001>
module attributes {stable_mosaic.version = 11 : i64} {
  func.func @_cross_transformer_kernel(%arg0: i32, %arg1: memref<1x64x16xf32, #tpu.memory_space<vmem>>, %arg2: memref<1x64x16xf32, #tpu.memory_space<vmem>>, %arg3: memref<32x64xf32, #tpu.memory_space<vmem>>, %arg4: memref<32x1xf32, #tpu.memory_space<vmem>>, %arg5: memref<32x1xf32, #tpu.memory_space<vmem>>, %arg6: memref<32x1xf32, #tpu.memory_space<vmem>>, %arg7: memref<32x32xf32, #tpu.memory_space<vmem>>, %arg8: memref<32x1xf32, #tpu.memory_space<vmem>>, %arg9: memref<32x32xf32, #tpu.memory_space<vmem>>, %arg10: memref<32x1xf32, #tpu.memory_space<vmem>>, %arg11: memref<32x32xf32, #tpu.memory_space<vmem>>, %arg12: memref<32x1xf32, #tpu.memory_space<vmem>>, %arg13: memref<32x32xf32, #tpu.memory_space<vmem>>, %arg14: memref<32x1xf32, #tpu.memory_space<vmem>>, %arg15: memref<32x1xf32, #tpu.memory_space<vmem>>, %arg16: memref<32x1xf32, #tpu.memory_space<vmem>>, %arg17: memref<64x32xf32, #tpu.memory_space<vmem>>, %arg18: memref<64x1xf32, #tpu.memory_space<vmem>>, %arg19: memref<32x64xf32, #tpu.memory_space<vmem>>, %arg20: memref<32x1xf32, #tpu.memory_space<vmem>>, %arg21: memref<1x32x16xf32, #tpu.memory_space<vmem>>) attributes {dimension_semantics = [#tpu.dimension_semantics<parallel>], iteration_bounds = array<i64: 2>, scalar_prefetch = 0 : i64, scratch_operands = 0 : i64, tpu.core_type = #tpu.core_type<tc>, window_params = [{transform_indices = @transform_0, window_bounds = array<i64: 1, 64, 16>}, {transform_indices = @transform_1, window_bounds = array<i64: 1, 64, 16>}, {pipeline_mode = #tpu.pipeline_mode<synchronous>, transform_indices = @transform_2, window_bounds = array<i64: 32, 64>}, {pipeline_mode = #tpu.pipeline_mode<synchronous>, transform_indices = @transform_3, window_bounds = array<i64: 32, 1>}, {pipeline_mode = #tpu.pipeline_mode<synchronous>, transform_indices = @transform_4, window_bounds = array<i64: 32, 1>}, {pipeline_mode = #tpu.pipeline_mode<synchronous>, transform_indices = @transform_5, window_bounds = array<i64: 32, 1>}, {pipeline_mode = #tpu.pipeline_mode<synchronous>, transform_indices = @transform_6, window_bounds = array<i64: 32, 32>}, {pipeline_mode = #tpu.pipeline_mode<synchronous>, transform_indices = @transform_7, window_bounds = array<i64: 32, 1>}, {pipeline_mode = #tpu.pipeline_mode<synchronous>, transform_indices = @transform_8, window_bounds = array<i64: 32, 32>}, {pipeline_mode = #tpu.pipeline_mode<synchronous>, transform_indices = @transform_9, window_bounds = array<i64: 32, 1>}, {pipeline_mode = #tpu.pipeline_mode<synchronous>, transform_indices = @transform_10, window_bounds = array<i64: 32, 32>}, {pipeline_mode = #tpu.pipeline_mode<synchronous>, transform_indices = @transform_11, window_bounds = array<i64: 32, 1>}, {pipeline_mode = #tpu.pipeline_mode<synchronous>, transform_indices = @transform_12, window_bounds = array<i64: 32, 32>}, {pipeline_mode = #tpu.pipeline_mode<synchronous>, transform_indices = @transform_13, window_bounds = array<i64: 32, 1>}, {pipeline_mode = #tpu.pipeline_mode<synchronous>, transform_indices = @transform_14, window_bounds = array<i64: 32, 1>}, {pipeline_mode = #tpu.pipeline_mode<synchronous>, transform_indices = @transform_15, window_bounds = array<i64: 32, 1>}, {pipeline_mode = #tpu.pipeline_mode<synchronous>, transform_indices = @transform_16, window_bounds = array<i64: 64, 32>}, {pipeline_mode = #tpu.pipeline_mode<synchronous>, transform_indices = @transform_17, window_bounds = array<i64: 64, 1>}, {pipeline_mode = #tpu.pipeline_mode<synchronous>, transform_indices = @transform_18, window_bounds = array<i64: 32, 64>}, {pipeline_mode = #tpu.pipeline_mode<synchronous>, transform_indices = @transform_19, window_bounds = array<i64: 32, 1>}, {transform_indices = @transform_20, window_bounds = array<i64: 1, 32, 16>}]} {
    %c0 = arith.constant 0 : index
    %c0_0 = arith.constant 0 : index
    %0 = vector.load %arg3[%c0, %c0_0] : memref<32x64xf32, #tpu.memory_space<vmem>>, vector<32x64xf32>
    %c0_1 = arith.constant 0 : index
    %c0_2 = arith.constant 0 : index
    %1 = vector.load %arg4[%c0_1, %c0_2] : memref<32x1xf32, #tpu.memory_space<vmem>>, vector<32x1xf32>
    %c0_3 = arith.constant 0 : index
    %c0_4 = arith.constant 0 : index
    %2 = vector.load %arg5[%c0_3, %c0_4] : memref<32x1xf32, #tpu.memory_space<vmem>>, vector<32x1xf32>
    %c0_5 = arith.constant 0 : index
    %c0_6 = arith.constant 0 : index
    %3 = vector.load %arg6[%c0_5, %c0_6] : memref<32x1xf32, #tpu.memory_space<vmem>>, vector<32x1xf32>
    %c0_7 = arith.constant 0 : index
    %c0_8 = arith.constant 0 : index
    %c0_9 = arith.constant 0 : index
    %4 = vector.load %arg1[%c0_7, %c0_8, %c0_9] : memref<1x64x16xf32, #tpu.memory_space<vmem>>, vector<1x64x16xf32>
    %5 = vector.shape_cast %4 : vector<1x64x16xf32> to vector<64x16xf32>
    %cst = arith.constant dense<0.000000e+00> : vector<32x16xf32>
    %6 = tpu.matmul %0, %5, %cst {dimension_numbers = #tpu.dot_dimension_numbers<[1], [0], [0], [1], [0, 0, 1, 1], [], []>} : vector<32x64xf32>, vector<64x16xf32>, vector<32x16xf32> -> vector<32x16xf32>
    %7 = vector.broadcast %1 : vector<32x1xf32> to vector<32x16xf32>
    %8 = arith.addf %6, %7 : vector<32x16xf32>
    %cst_10 = arith.constant dense<0.000000e+00> : vector<16xf32>
    %9 = vector.multi_reduction <add>, %8, %cst_10 [0] : vector<32x16xf32> to vector<16xf32>
    %10 = vector.shape_cast %9 : vector<16xf32> to vector<1x16xf32>
    %cst_11 = arith.constant 3.125000e-02 : f32
    %11 = vector.broadcast %cst_11 : f32 to vector<1x16xf32>
    %12 = arith.mulf %10, %11 : vector<1x16xf32>
    %13 = vector.broadcast %12 : vector<1x16xf32> to vector<32x16xf32>
    %14 = arith.subf %8, %13 : vector<32x16xf32>
    %15 = arith.mulf %14, %14 : vector<32x16xf32>
    %cst_12 = arith.constant dense<0.000000e+00> : vector<16xf32>
    %16 = vector.multi_reduction <add>, %15, %cst_12 [0] : vector<32x16xf32> to vector<16xf32>
    %17 = vector.shape_cast %16 : vector<16xf32> to vector<1x16xf32>
    %cst_13 = arith.constant 3.125000e-02 : f32
    %18 = vector.broadcast %cst_13 : f32 to vector<1x16xf32>
    %19 = arith.mulf %17, %18 : vector<1x16xf32>
    %cst_14 = arith.constant 9.99999974E-6 : f32
    %20 = vector.broadcast %cst_14 : f32 to vector<1x16xf32>
    %21 = arith.addf %19, %20 : vector<1x16xf32>
    %22 = math.rsqrt %21 : vector<1x16xf32>
    %23 = vector.broadcast %22 : vector<1x16xf32> to vector<32x16xf32>
    %24 = arith.mulf %14, %23 : vector<32x16xf32>
    %25 = vector.broadcast %2 : vector<32x1xf32> to vector<32x16xf32>
    %26 = arith.mulf %24, %25 : vector<32x16xf32>
    %27 = vector.broadcast %3 : vector<32x1xf32> to vector<32x16xf32>
    %28 = arith.addf %26, %27 : vector<32x16xf32>
    %c0_15 = arith.constant 0 : index
    %c0_16 = arith.constant 0 : index
    %c0_17 = arith.constant 0 : index
    %29 = vector.load %arg2[%c0_15, %c0_16, %c0_17] : memref<1x64x16xf32, #tpu.memory_space<vmem>>, vector<1x64x16xf32>
    %30 = vector.shape_cast %29 : vector<1x64x16xf32> to vector<64x16xf32>
    %cst_18 = arith.constant dense<0.000000e+00> : vector<32x16xf32>
    %31 = tpu.matmul %0, %30, %cst_18 {dimension_numbers = #tpu.dot_dimension_numbers<[1], [0], [0], [1], [0, 0, 1, 1], [], []>} : vector<32x64xf32>, vector<64x16xf32>, vector<32x16xf32> -> vector<32x16xf32>
    %32 = vector.broadcast %1 : vector<32x1xf32> to vector<32x16xf32>
    %33 = arith.addf %31, %32 : vector<32x16xf32>
    %cst_19 = arith.constant dense<0.000000e+00> : vector<16xf32>
    %34 = vector.multi_reduction <add>, %33, %cst_19 [0] : vector<32x16xf32> to vector<16xf32>
    %35 = vector.shape_cast %34 : vector<16xf32> to vector<1x16xf32>
    %cst_20 = arith.constant 3.125000e-02 : f32
    %36 = vector.broadcast %cst_20 : f32 to vector<1x16xf32>
    %37 = arith.mulf %35, %36 : vector<1x16xf32>
    %38 = vector.broadcast %37 : vector<1x16xf32> to vector<32x16xf32>
    %39 = arith.subf %33, %38 : vector<32x16xf32>
    %40 = arith.mulf %39, %39 : vector<32x16xf32>
    %cst_21 = arith.constant dense<0.000000e+00> : vector<16xf32>
    %41 = vector.multi_reduction <add>, %40, %cst_21 [0] : vector<32x16xf32> to vector<16xf32>
    %42 = vector.shape_cast %41 : vector<16xf32> to vector<1x16xf32>
    %cst_22 = arith.constant 3.125000e-02 : f32
    %43 = vector.broadcast %cst_22 : f32 to vector<1x16xf32>
    %44 = arith.mulf %42, %43 : vector<1x16xf32>
    %cst_23 = arith.constant 9.99999974E-6 : f32
    %45 = vector.broadcast %cst_23 : f32 to vector<1x16xf32>
    %46 = arith.addf %44, %45 : vector<1x16xf32>
    %47 = math.rsqrt %46 : vector<1x16xf32>
    %48 = vector.broadcast %47 : vector<1x16xf32> to vector<32x16xf32>
    %49 = arith.mulf %39, %48 : vector<32x16xf32>
    %50 = vector.broadcast %2 : vector<32x1xf32> to vector<32x16xf32>
    %51 = arith.mulf %49, %50 : vector<32x16xf32>
    %52 = vector.broadcast %3 : vector<32x1xf32> to vector<32x16xf32>
    %53 = arith.addf %51, %52 : vector<32x16xf32>
    %c0_24 = arith.constant 0 : index
    %c0_25 = arith.constant 0 : index
    %54 = vector.load %arg7[%c0_24, %c0_25] : memref<32x32xf32, #tpu.memory_space<vmem>>, vector<32x32xf32>
    %cst_26 = arith.constant dense<0.000000e+00> : vector<32x16xf32>
    %55 = tpu.matmul %54, %28, %cst_26 {dimension_numbers = #tpu.dot_dimension_numbers<[1], [0], [0], [1], [0, 0, 1, 1], [], []>} : vector<32x32xf32>, vector<32x16xf32>, vector<32x16xf32> -> vector<32x16xf32>
    %c0_27 = arith.constant 0 : index
    %c0_28 = arith.constant 0 : index
    %56 = vector.load %arg8[%c0_27, %c0_28] : memref<32x1xf32, #tpu.memory_space<vmem>>, vector<32x1xf32>
    %57 = vector.broadcast %56 : vector<32x1xf32> to vector<32x16xf32>
    %58 = arith.addf %55, %57 : vector<32x16xf32>
    %c0_29 = arith.constant 0 : index
    %c0_30 = arith.constant 0 : index
    %59 = vector.load %arg9[%c0_29, %c0_30] : memref<32x32xf32, #tpu.memory_space<vmem>>, vector<32x32xf32>
    %cst_31 = arith.constant dense<0.000000e+00> : vector<32x16xf32>
    %60 = tpu.matmul %59, %53, %cst_31 {dimension_numbers = #tpu.dot_dimension_numbers<[1], [0], [0], [1], [0, 0, 1, 1], [], []>} : vector<32x32xf32>, vector<32x16xf32>, vector<32x16xf32> -> vector<32x16xf32>
    %c0_32 = arith.constant 0 : index
    %c0_33 = arith.constant 0 : index
    %61 = vector.load %arg10[%c0_32, %c0_33] : memref<32x1xf32, #tpu.memory_space<vmem>>, vector<32x1xf32>
    %62 = vector.broadcast %61 : vector<32x1xf32> to vector<32x16xf32>
    %63 = arith.addf %60, %62 : vector<32x16xf32>
    %c0_34 = arith.constant 0 : index
    %c0_35 = arith.constant 0 : index
    %64 = vector.load %arg11[%c0_34, %c0_35] : memref<32x32xf32, #tpu.memory_space<vmem>>, vector<32x32xf32>
    %cst_36 = arith.constant dense<0.000000e+00> : vector<32x16xf32>
    %65 = tpu.matmul %64, %53, %cst_36 {dimension_numbers = #tpu.dot_dimension_numbers<[1], [0], [0], [1], [0, 0, 1, 1], [], []>} : vector<32x32xf32>, vector<32x16xf32>, vector<32x16xf32> -> vector<32x16xf32>
    %c0_37 = arith.constant 0 : index
    %c0_38 = arith.constant 0 : index
    %66 = vector.load %arg12[%c0_37, %c0_38] : memref<32x1xf32, #tpu.memory_space<vmem>>, vector<32x1xf32>
    %67 = vector.broadcast %66 : vector<32x1xf32> to vector<32x16xf32>
    %68 = arith.addf %65, %67 : vector<32x16xf32>
    %69 = vector.extract_strided_slice %58 {offsets = [0, 0], sizes = [8, 16], strides = [1, 1]} : vector<32x16xf32> to vector<8x16xf32>
    %cst_39 = arith.constant 0.353553385 : f32
    %70 = vector.broadcast %cst_39 : f32 to vector<8x16xf32>
    %71 = arith.mulf %69, %70 : vector<8x16xf32>
    %72 = vector.extract_strided_slice %63 {offsets = [0, 0], sizes = [8, 16], strides = [1, 1]} : vector<32x16xf32> to vector<8x16xf32>
    %73 = vector.extract_strided_slice %68 {offsets = [0, 0], sizes = [8, 16], strides = [1, 1]} : vector<32x16xf32> to vector<8x16xf32>
    %cst_40 = arith.constant dense<0.000000e+00> : vector<16x16xf32>
    %74 = tpu.matmul %71, %72, %cst_40 {dimension_numbers = #tpu.dot_dimension_numbers<[0], [0], [1], [1], [0, 1, 1, 1], [], []>} : vector<8x16xf32>, vector<8x16xf32>, vector<16x16xf32> -> vector<16x16xf32>
    %cst_41 = arith.constant dense<0xFF800000> : vector<16xf32>
    %75 = vector.multi_reduction <maximumf>, %74, %cst_41 [1] : vector<16x16xf32> to vector<16xf32>
    %76 = vector.shape_cast %75 : vector<16xf32> to vector<16x1xf32>
    %77 = vector.broadcast %76 : vector<16x1xf32> to vector<16x16xf32>
    %78 = arith.subf %74, %77 : vector<16x16xf32>
    %79 = math.exp %78 : vector<16x16xf32>
    %cst_42 = arith.constant dense<0.000000e+00> : vector<16xf32>
    %80 = vector.multi_reduction <add>, %79, %cst_42 [1] : vector<16x16xf32> to vector<16xf32>
    %81 = vector.shape_cast %80 : vector<16xf32> to vector<16x1xf32>
    %82 = tpu.reciprocal %81 : vector<16x1xf32> -> vector<16x1xf32>
    %83 = vector.broadcast %82 : vector<16x1xf32> to vector<16x16xf32>
    %84 = arith.mulf %79, %83 : vector<16x16xf32>
    %cst_43 = arith.constant dense<0.000000e+00> : vector<8x16xf32>
    %85 = tpu.matmul %73, %84, %cst_43 {dimension_numbers = #tpu.dot_dimension_numbers<[1], [1], [0], [0], [0, 0, 1, 0], [], []>} : vector<8x16xf32>, vector<16x16xf32>, vector<8x16xf32> -> vector<8x16xf32>
    %86 = vector.extract_strided_slice %58 {offsets = [8, 0], sizes = [8, 16], strides = [1, 1]} : vector<32x16xf32> to vector<8x16xf32>
    %cst_44 = arith.constant 0.353553385 : f32
    %87 = vector.broadcast %cst_44 : f32 to vector<8x16xf32>
    %88 = arith.mulf %86, %87 : vector<8x16xf32>
    %89 = vector.extract_strided_slice %63 {offsets = [8, 0], sizes = [8, 16], strides = [1, 1]} : vector<32x16xf32> to vector<8x16xf32>
    %90 = vector.extract_strided_slice %68 {offsets = [8, 0], sizes = [8, 16], strides = [1, 1]} : vector<32x16xf32> to vector<8x16xf32>
    %cst_45 = arith.constant dense<0.000000e+00> : vector<16x16xf32>
    %91 = tpu.matmul %88, %89, %cst_45 {dimension_numbers = #tpu.dot_dimension_numbers<[0], [0], [1], [1], [0, 1, 1, 1], [], []>} : vector<8x16xf32>, vector<8x16xf32>, vector<16x16xf32> -> vector<16x16xf32>
    %cst_46 = arith.constant dense<0xFF800000> : vector<16xf32>
    %92 = vector.multi_reduction <maximumf>, %91, %cst_46 [1] : vector<16x16xf32> to vector<16xf32>
    %93 = vector.shape_cast %92 : vector<16xf32> to vector<16x1xf32>
    %94 = vector.broadcast %93 : vector<16x1xf32> to vector<16x16xf32>
    %95 = arith.subf %91, %94 : vector<16x16xf32>
    %96 = math.exp %95 : vector<16x16xf32>
    %cst_47 = arith.constant dense<0.000000e+00> : vector<16xf32>
    %97 = vector.multi_reduction <add>, %96, %cst_47 [1] : vector<16x16xf32> to vector<16xf32>
    %98 = vector.shape_cast %97 : vector<16xf32> to vector<16x1xf32>
    %99 = tpu.reciprocal %98 : vector<16x1xf32> -> vector<16x1xf32>
    %100 = vector.broadcast %99 : vector<16x1xf32> to vector<16x16xf32>
    %101 = arith.mulf %96, %100 : vector<16x16xf32>
    %cst_48 = arith.constant dense<0.000000e+00> : vector<8x16xf32>
    %102 = tpu.matmul %90, %101, %cst_48 {dimension_numbers = #tpu.dot_dimension_numbers<[1], [1], [0], [0], [0, 0, 1, 0], [], []>} : vector<8x16xf32>, vector<16x16xf32>, vector<8x16xf32> -> vector<8x16xf32>
    %103 = vector.extract_strided_slice %58 {offsets = [16, 0], sizes = [8, 16], strides = [1, 1]} : vector<32x16xf32> to vector<8x16xf32>
    %cst_49 = arith.constant 0.353553385 : f32
    %104 = vector.broadcast %cst_49 : f32 to vector<8x16xf32>
    %105 = arith.mulf %103, %104 : vector<8x16xf32>
    %106 = vector.extract_strided_slice %63 {offsets = [16, 0], sizes = [8, 16], strides = [1, 1]} : vector<32x16xf32> to vector<8x16xf32>
    %107 = vector.extract_strided_slice %68 {offsets = [16, 0], sizes = [8, 16], strides = [1, 1]} : vector<32x16xf32> to vector<8x16xf32>
    %cst_50 = arith.constant dense<0.000000e+00> : vector<16x16xf32>
    %108 = tpu.matmul %105, %106, %cst_50 {dimension_numbers = #tpu.dot_dimension_numbers<[0], [0], [1], [1], [0, 1, 1, 1], [], []>} : vector<8x16xf32>, vector<8x16xf32>, vector<16x16xf32> -> vector<16x16xf32>
    %cst_51 = arith.constant dense<0xFF800000> : vector<16xf32>
    %109 = vector.multi_reduction <maximumf>, %108, %cst_51 [1] : vector<16x16xf32> to vector<16xf32>
    %110 = vector.shape_cast %109 : vector<16xf32> to vector<16x1xf32>
    %111 = vector.broadcast %110 : vector<16x1xf32> to vector<16x16xf32>
    %112 = arith.subf %108, %111 : vector<16x16xf32>
    %113 = math.exp %112 : vector<16x16xf32>
    %cst_52 = arith.constant dense<0.000000e+00> : vector<16xf32>
    %114 = vector.multi_reduction <add>, %113, %cst_52 [1] : vector<16x16xf32> to vector<16xf32>
    %115 = vector.shape_cast %114 : vector<16xf32> to vector<16x1xf32>
    %116 = tpu.reciprocal %115 : vector<16x1xf32> -> vector<16x1xf32>
    %117 = vector.broadcast %116 : vector<16x1xf32> to vector<16x16xf32>
    %118 = arith.mulf %113, %117 : vector<16x16xf32>
    %cst_53 = arith.constant dense<0.000000e+00> : vector<8x16xf32>
    %119 = tpu.matmul %107, %118, %cst_53 {dimension_numbers = #tpu.dot_dimension_numbers<[1], [1], [0], [0], [0, 0, 1, 0], [], []>} : vector<8x16xf32>, vector<16x16xf32>, vector<8x16xf32> -> vector<8x16xf32>
    %120 = vector.extract_strided_slice %58 {offsets = [24, 0], sizes = [8, 16], strides = [1, 1]} : vector<32x16xf32> to vector<8x16xf32>
    %cst_54 = arith.constant 0.353553385 : f32
    %121 = vector.broadcast %cst_54 : f32 to vector<8x16xf32>
    %122 = arith.mulf %120, %121 : vector<8x16xf32>
    %123 = vector.extract_strided_slice %63 {offsets = [24, 0], sizes = [8, 16], strides = [1, 1]} : vector<32x16xf32> to vector<8x16xf32>
    %124 = vector.extract_strided_slice %68 {offsets = [24, 0], sizes = [8, 16], strides = [1, 1]} : vector<32x16xf32> to vector<8x16xf32>
    %cst_55 = arith.constant dense<0.000000e+00> : vector<16x16xf32>
    %125 = tpu.matmul %122, %123, %cst_55 {dimension_numbers = #tpu.dot_dimension_numbers<[0], [0], [1], [1], [0, 1, 1, 1], [], []>} : vector<8x16xf32>, vector<8x16xf32>, vector<16x16xf32> -> vector<16x16xf32>
    %cst_56 = arith.constant dense<0xFF800000> : vector<16xf32>
    %126 = vector.multi_reduction <maximumf>, %125, %cst_56 [1] : vector<16x16xf32> to vector<16xf32>
    %127 = vector.shape_cast %126 : vector<16xf32> to vector<16x1xf32>
    %128 = vector.broadcast %127 : vector<16x1xf32> to vector<16x16xf32>
    %129 = arith.subf %125, %128 : vector<16x16xf32>
    %130 = math.exp %129 : vector<16x16xf32>
    %cst_57 = arith.constant dense<0.000000e+00> : vector<16xf32>
    %131 = vector.multi_reduction <add>, %130, %cst_57 [1] : vector<16x16xf32> to vector<16xf32>
    %132 = vector.shape_cast %131 : vector<16xf32> to vector<16x1xf32>
    %133 = tpu.reciprocal %132 : vector<16x1xf32> -> vector<16x1xf32>
    %134 = vector.broadcast %133 : vector<16x1xf32> to vector<16x16xf32>
    %135 = arith.mulf %130, %134 : vector<16x16xf32>
    %cst_58 = arith.constant dense<0.000000e+00> : vector<8x16xf32>
    %136 = tpu.matmul %124, %135, %cst_58 {dimension_numbers = #tpu.dot_dimension_numbers<[1], [1], [0], [0], [0, 0, 1, 0], [], []>} : vector<8x16xf32>, vector<16x16xf32>, vector<8x16xf32> -> vector<8x16xf32>
    %137 = tpu.concatenate %85, %102, %119, %136 in 0 : vector<8x16xf32>, vector<8x16xf32>, vector<8x16xf32>, vector<8x16xf32> -> vector<32x16xf32>
    %c0_59 = arith.constant 0 : index
    %c0_60 = arith.constant 0 : index
    %138 = vector.load %arg13[%c0_59, %c0_60] : memref<32x32xf32, #tpu.memory_space<vmem>>, vector<32x32xf32>
    %cst_61 = arith.constant dense<0.000000e+00> : vector<32x16xf32>
    %139 = tpu.matmul %138, %137, %cst_61 {dimension_numbers = #tpu.dot_dimension_numbers<[1], [0], [0], [1], [0, 0, 1, 1], [], []>} : vector<32x32xf32>, vector<32x16xf32>, vector<32x16xf32> -> vector<32x16xf32>
    %c0_62 = arith.constant 0 : index
    %c0_63 = arith.constant 0 : index
    %140 = vector.load %arg14[%c0_62, %c0_63] : memref<32x1xf32, #tpu.memory_space<vmem>>, vector<32x1xf32>
    %141 = vector.broadcast %140 : vector<32x1xf32> to vector<32x16xf32>
    %142 = arith.addf %139, %141 : vector<32x16xf32>
    %143 = arith.addf %28, %142 : vector<32x16xf32>
    %c0_64 = arith.constant 0 : index
    %c0_65 = arith.constant 0 : index
    %144 = vector.load %arg15[%c0_64, %c0_65] : memref<32x1xf32, #tpu.memory_space<vmem>>, vector<32x1xf32>
    %c0_66 = arith.constant 0 : index
    %c0_67 = arith.constant 0 : index
    %145 = vector.load %arg16[%c0_66, %c0_67] : memref<32x1xf32, #tpu.memory_space<vmem>>, vector<32x1xf32>
    %cst_68 = arith.constant dense<0.000000e+00> : vector<16xf32>
    %146 = vector.multi_reduction <add>, %143, %cst_68 [0] : vector<32x16xf32> to vector<16xf32>
    %147 = vector.shape_cast %146 : vector<16xf32> to vector<1x16xf32>
    %cst_69 = arith.constant 3.125000e-02 : f32
    %148 = vector.broadcast %cst_69 : f32 to vector<1x16xf32>
    %149 = arith.mulf %147, %148 : vector<1x16xf32>
    %150 = vector.broadcast %149 : vector<1x16xf32> to vector<32x16xf32>
    %151 = arith.subf %143, %150 : vector<32x16xf32>
    %152 = arith.mulf %151, %151 : vector<32x16xf32>
    %cst_70 = arith.constant dense<0.000000e+00> : vector<16xf32>
    %153 = vector.multi_reduction <add>, %152, %cst_70 [0] : vector<32x16xf32> to vector<16xf32>
    %154 = vector.shape_cast %153 : vector<16xf32> to vector<1x16xf32>
    %cst_71 = arith.constant 3.125000e-02 : f32
    %155 = vector.broadcast %cst_71 : f32 to vector<1x16xf32>
    %156 = arith.mulf %154, %155 : vector<1x16xf32>
    %cst_72 = arith.constant 9.99999974E-6 : f32
    %157 = vector.broadcast %cst_72 : f32 to vector<1x16xf32>
    %158 = arith.addf %156, %157 : vector<1x16xf32>
    %159 = math.rsqrt %158 : vector<1x16xf32>
    %160 = vector.broadcast %159 : vector<1x16xf32> to vector<32x16xf32>
    %161 = arith.mulf %151, %160 : vector<32x16xf32>
    %162 = vector.broadcast %144 : vector<32x1xf32> to vector<32x16xf32>
    %163 = arith.mulf %161, %162 : vector<32x16xf32>
    %164 = vector.broadcast %145 : vector<32x1xf32> to vector<32x16xf32>
    %165 = arith.addf %163, %164 : vector<32x16xf32>
    %c0_73 = arith.constant 0 : index
    %c0_74 = arith.constant 0 : index
    %166 = vector.load %arg17[%c0_73, %c0_74] : memref<64x32xf32, #tpu.memory_space<vmem>>, vector<64x32xf32>
    %cst_75 = arith.constant dense<0.000000e+00> : vector<64x16xf32>
    %167 = tpu.matmul %166, %165, %cst_75 {dimension_numbers = #tpu.dot_dimension_numbers<[1], [0], [0], [1], [0, 0, 1, 1], [], []>} : vector<64x32xf32>, vector<32x16xf32>, vector<64x16xf32> -> vector<64x16xf32>
    %c0_76 = arith.constant 0 : index
    %c0_77 = arith.constant 0 : index
    %168 = vector.load %arg18[%c0_76, %c0_77] : memref<64x1xf32, #tpu.memory_space<vmem>>, vector<64x1xf32>
    %169 = vector.broadcast %168 : vector<64x1xf32> to vector<64x16xf32>
    %170 = arith.addf %167, %169 : vector<64x16xf32>
    %c0_78 = arith.constant 0 : index
    %c0_79 = arith.constant 0 : index
    %171 = vector.load %arg19[%c0_78, %c0_79] : memref<32x64xf32, #tpu.memory_space<vmem>>, vector<32x64xf32>
    %cst_80 = arith.constant 5.000000e-01 : f32
    %172 = vector.broadcast %cst_80 : f32 to vector<64x16xf32>
    %173 = arith.mulf %172, %170 : vector<64x16xf32>
    %cst_81 = arith.constant 4.471500e-02 : f32
    %174 = vector.broadcast %cst_81 : f32 to vector<64x16xf32>
    %175 = arith.mulf %174, %170 : vector<64x16xf32>
    %176 = arith.mulf %175, %170 : vector<64x16xf32>
    %177 = arith.mulf %176, %170 : vector<64x16xf32>
    %178 = arith.addf %170, %177 : vector<64x16xf32>
    %cst_82 = arith.constant 0.797884583 : f32
    %179 = vector.broadcast %cst_82 : f32 to vector<64x16xf32>
    %180 = arith.mulf %179, %178 : vector<64x16xf32>
    %181 = math.tanh %180 : vector<64x16xf32>
    %cst_83 = arith.constant 1.000000e+00 : f32
    %182 = vector.broadcast %cst_83 : f32 to vector<64x16xf32>
    %183 = arith.addf %182, %181 : vector<64x16xf32>
    %184 = arith.mulf %173, %183 : vector<64x16xf32>
    %cst_84 = arith.constant dense<0.000000e+00> : vector<32x16xf32>
    %185 = tpu.matmul %171, %184, %cst_84 {dimension_numbers = #tpu.dot_dimension_numbers<[1], [0], [0], [1], [0, 0, 1, 1], [], []>} : vector<32x64xf32>, vector<64x16xf32>, vector<32x16xf32> -> vector<32x16xf32>
    %c0_85 = arith.constant 0 : index
    %c0_86 = arith.constant 0 : index
    %186 = vector.load %arg20[%c0_85, %c0_86] : memref<32x1xf32, #tpu.memory_space<vmem>>, vector<32x1xf32>
    %187 = vector.broadcast %186 : vector<32x1xf32> to vector<32x16xf32>
    %188 = arith.addf %185, %187 : vector<32x16xf32>
    %189 = arith.addf %165, %188 : vector<32x16xf32>
    %c0_87 = arith.constant 0 : index
    %c0_88 = arith.constant 0 : index
    %c0_89 = arith.constant 0 : index
    %190 = vector.load %arg21[%c0_87, %c0_88, %c0_89] : memref<1x32x16xf32, #tpu.memory_space<vmem>>, vector<1x32x16xf32>
    %191 = vector.shape_cast %190 : vector<1x32x16xf32> to vector<32x16xf32>
    %192 = vector.shape_cast %189 : vector<32x16xf32> to vector<1x32x16xf32>
    tpu.vector_store %arg21[%c0_87, %c0_88, %c0_89], %192 {strides = array<i32>} : memref<1x32x16xf32, #tpu.memory_space<vmem>>, vector<1x32x16xf32>,
    return
  }
  func.func @transform_0(%arg0: i32) -> (i32, i32, i32) {
    %c0_i32 = arith.constant 0 : i32
    %c0_i32_0 = arith.constant 0 : i32
    %c0_i32_1 = arith.constant 0 : i32
    return %arg0, %c0_i32, %c0_i32_0 : i32, i32, i32
  }
  func.func @transform_1(%arg0: i32) -> (i32, i32, i32) {
    %c0_i32 = arith.constant 0 : i32
    %c0_i32_0 = arith.constant 0 : i32
    %c0_i32_1 = arith.constant 0 : i32
    return %arg0, %c0_i32, %c0_i32_0 : i32, i32, i32
  }
  func.func @transform_2(%arg0: i32) -> (i32, i32) {
    %c0_i32 = arith.constant 0 : i32
    %c0_i32_0 = arith.constant 0 : i32
    %c0_i32_1 = arith.constant 0 : i32
    return %c0_i32, %c0_i32_0 : i32, i32
  }
  func.func @transform_3(%arg0: i32) -> (i32, i32) {
    %c0_i32 = arith.constant 0 : i32
    %c0_i32_0 = arith.constant 0 : i32
    %c0_i32_1 = arith.constant 0 : i32
    return %c0_i32, %c0_i32_0 : i32, i32
  }
  func.func @transform_4(%arg0: i32) -> (i32, i32) {
    %c0_i32 = arith.constant 0 : i32
    %c0_i32_0 = arith.constant 0 : i32
    %c0_i32_1 = arith.constant 0 : i32
    return %c0_i32, %c0_i32_0 : i32, i32
  }
  func.func @transform_5(%arg0: i32) -> (i32, i32) {
    %c0_i32 = arith.constant 0 : i32
    %c0_i32_0 = arith.constant 0 : i32
    %c0_i32_1 = arith.constant 0 : i32
    return %c0_i32, %c0_i32_0 : i32, i32
  }
  func.func @transform_6(%arg0: i32) -> (i32, i32) {
    %c0_i32 = arith.constant 0 : i32
    %c0_i32_0 = arith.constant 0 : i32
    %c0_i32_1 = arith.constant 0 : i32
    return %c0_i32, %c0_i32_0 : i32, i32
  }
  func.func @transform_7(%arg0: i32) -> (i32, i32) {
    %c0_i32 = arith.constant 0 : i32
    %c0_i32_0 = arith.constant 0 : i32
    %c0_i32_1 = arith.constant 0 : i32
    return %c0_i32, %c0_i32_0 : i32, i32
  }
  func.func @transform_8(%arg0: i32) -> (i32, i32) {
    %c0_i32 = arith.constant 0 : i32
    %c0_i32_0 = arith.constant 0 : i32
    %c0_i32_1 = arith.constant 0 : i32
    return %c0_i32, %c0_i32_0 : i32, i32
  }
  func.func @transform_9(%arg0: i32) -> (i32, i32) {
    %c0_i32 = arith.constant 0 : i32
    %c0_i32_0 = arith.constant 0 : i32
    %c0_i32_1 = arith.constant 0 : i32
    return %c0_i32, %c0_i32_0 : i32, i32
  }
  func.func @transform_10(%arg0: i32) -> (i32, i32) {
    %c0_i32 = arith.constant 0 : i32
    %c0_i32_0 = arith.constant 0 : i32
    %c0_i32_1 = arith.constant 0 : i32
    return %c0_i32, %c0_i32_0 : i32, i32
  }
  func.func @transform_11(%arg0: i32) -> (i32, i32) {
    %c0_i32 = arith.constant 0 : i32
    %c0_i32_0 = arith.constant 0 : i32
    %c0_i32_1 = arith.constant 0 : i32
    return %c0_i32, %c0_i32_0 : i32, i32
  }
  func.func @transform_12(%arg0: i32) -> (i32, i32) {
    %c0_i32 = arith.constant 0 : i32
    %c0_i32_0 = arith.constant 0 : i32
    %c0_i32_1 = arith.constant 0 : i32
    return %c0_i32, %c0_i32_0 : i32, i32
  }
  func.func @transform_13(%arg0: i32) -> (i32, i32) {
    %c0_i32 = arith.constant 0 : i32
    %c0_i32_0 = arith.constant 0 : i32
    %c0_i32_1 = arith.constant 0 : i32
    return %c0_i32, %c0_i32_0 : i32, i32
  }
  func.func @transform_14(%arg0: i32) -> (i32, i32) {
    %c0_i32 = arith.constant 0 : i32
    %c0_i32_0 = arith.constant 0 : i32
    %c0_i32_1 = arith.constant 0 : i32
    return %c0_i32, %c0_i32_0 : i32, i32
  }
  func.func @transform_15(%arg0: i32) -> (i32, i32) {
    %c0_i32 = arith.constant 0 : i32
    %c0_i32_0 = arith.constant 0 : i32
    %c0_i32_1 = arith.constant 0 : i32
    return %c0_i32, %c0_i32_0 : i32, i32
  }
  func.func @transform_16(%arg0: i32) -> (i32, i32) {
    %c0_i32 = arith.constant 0 : i32
    %c0_i32_0 = arith.constant 0 : i32
    %c0_i32_1 = arith.constant 0 : i32
    return %c0_i32, %c0_i32_0 : i32, i32
  }
  func.func @transform_17(%arg0: i32) -> (i32, i32) {
    %c0_i32 = arith.constant 0 : i32
    %c0_i32_0 = arith.constant 0 : i32
    %c0_i32_1 = arith.constant 0 : i32
    return %c0_i32, %c0_i32_0 : i32, i32
  }
  func.func @transform_18(%arg0: i32) -> (i32, i32) {
    %c0_i32 = arith.constant 0 : i32
    %c0_i32_0 = arith.constant 0 : i32
    %c0_i32_1 = arith.constant 0 : i32
    return %c0_i32, %c0_i32_0 : i32, i32
  }
  func.func @transform_19(%arg0: i32) -> (i32, i32) {
    %c0_i32 = arith.constant 0 : i32
    %c0_i32_0 = arith.constant 0 : i32
    %c0_i32_1 = arith.constant 0 : i32
    return %c0_i32, %c0_i32_0 : i32, i32
  }
  func.func @transform_20(%arg0: i32) -> (i32, i32, i32) {
    %c0_i32 = arith.constant 0 : i32
    %c0_i32_0 = arith.constant 0 : i32
    %c0_i32_1 = arith.constant 0 : i32
    return %arg0, %c0_i32, %c0_i32_0 : i32, i32, i32
  }
}

</mosaic_0001>

<bundles_post_ra>
// kernel: tpu_custom_call.1
= control target key start
LH: loop header
LB: loop body
LE: loop exit
PB: predicated region body
PF: predicated region fallthrough
CT: control target
= control target key end

     0   :  { %s4127_s0 = inlined_call_operand.vmem [shape: f32[2,64,16], index: 0, kind: input, shape index: {}]   ;;  %s4128_s1 = inlined_call_operand.vmem [shape: f32[2,64,16], index: 1, kind: input, shape index: {}]   ;;  %s4129_s2 = inlined_call_operand.vmem [shape: f32[32,64], index: 2, kind: input, shape index: {}]   ;;  %s4130_s3 = inlined_call_operand.vmem [shape: f32[32,1], index: 3, kind: input, shape index: {}]   ;;  %s4131_s4 = inlined_call_operand.vmem [shape: f32[32,1], index: 4, kind: input, shape index: {}]   ;;  %s4132_s5 = inlined_call_operand.vmem [shape: f32[32,1], index: 5, kind: input, shape index: {}]   ;;  %s4133_s6 = inlined_call_operand.vmem [shape: f32[32,32], index: 6, kind: input, shape index: {}]   ;;  %s4134_s7 = inlined_call_operand.vmem [shape: f32[32,1], index: 7, kind: input, shape index: {}]   ;;  %s4135_s8 = inlined_call_operand.vmem [shape: f32[32,32], index: 8, kind: input, shape index: {}]   ;;  %s4136_s9 = inlined_call_operand.vmem [shape: f32[32,1], index: 9, kind: input, shape index: {}]   ;;  %s4137_s10 = inlined_call_operand.vmem [shape: f32[32,32], index: 10, kind: input, shape index: {}]   ;;  %s4138_s11 = inlined_call_operand.vmem [shape: f32[32,1], index: 11, kind: input, shape index: {}]   ;;  %s4139_s12 = inlined_call_operand.vmem [shape: f32[32,32], index: 12, kind: input, shape index: {}]   ;;  %s4140_s13 = inlined_call_operand.vmem [shape: f32[32,1], index: 13, kind: input, shape index: {}]   ;;  %s4141_s14 = inlined_call_operand.vmem [shape: f32[32,1], index: 14, kind: input, shape index: {}]   ;;  %s4142_s15 = inlined_call_operand.vmem [shape: f32[32,1], index: 15, kind: input, shape index: {}]   ;;  %s4143_s16 = inlined_call_operand.vmem [shape: f32[64,32], index: 16, kind: input, shape index: {}]   ;;  %s4144_s17 = inlined_call_operand.vmem [shape: f32[64,1], index: 17, kind: input, shape index: {}]   ;;  %s4145_s18 = inlined_call_operand.vmem [shape: f32[32,64], index: 18, kind: input, shape index: {}]   ;;  %s4146_s19 = inlined_call_operand.vmem [shape: f32[32,1], index: 19, kind: input, shape index: {}]   ;;  %s4147_s20 = inlined_call_operand.vmem [shape: f32[2,32,16], index: 20, kind: output, shape index: {}]  }
   0x1   :  { %4152 = sst [smem:[#allocation3_spill]] %s4127_s0 }
   0x2   :  { %4153 = sst [smem:[#allocation4_spill]] %s4128_s1  ;;  %s3602_s1 = smov 0  }
   0x3   :  { %4154 = sst [smem:[#allocation5_spill]] %s4129_s2 }
   0x4   :  { %4155 = sst [smem:[#allocation6_spill]] %s4130_s3 }
   0x5   :  { %4156 = sst [smem:[#allocation7_spill]] %s4131_s4 }
   0x6   :  { %4157 = sst [smem:[#allocation8_spill]] %s4147_s20 }
   0x7 LB: > { %4158 = sst [smem:[#allocation2_spill]] %s3491_s1  ;;  %s2947_s22 = sadd.s32 4294967295, %s3491_s1   ;;  %s3491_s1 = sphi %s3602_s1, %s30_s1  }
   0x8   : > { %p2951_p0 = scmp.ge.s32.totalorder %s3491_s1, 1  ;;  %p572_p1 = scmp.lt.s32.totalorder %s3491_s1, 3 }
   0xa   : > { %p573_p2 = pnand %p2951_p0, %p572_p1 }
   0xb   : > { %p635_p3 = scmp.lt.s32.totalorder (!%p573_p2), %s2947_s22, 1  ;;  %s4159_s2 = sld [smem:[#allocation5_spill]] (!%p573_p2)  ;;  %vm694_vm0 = vcmask (!%p573_p2), 523264   ;;  %v3493_v3 = vmov (!%p573_p2), 0   ;;  %v662_v30 = vld [vmem:[%s4132_s5] sm:$0xff] (!%p573_p2)  ;;  %v663_v31 = vld [vmem:[%s4132_s5 + $0x8] sm:$0xff] (!%p573_p2) }
   0xc   : > { %576 = sbr.rel (%p573_p2) target bundleno = 2831 (0xb0f), region = 100  ;;  %s4160_s26 = sld [smem:[#allocation6_spill]] (!%p573_p2)  ;;  %3429 = vset.pattern.permute.xlu0 (!%p573_p2), %v3493_v3  ;;  %3430 = vset.pattern.permute.xlu1 (!%p573_p2), %v3493_v3  ;;  %v664_v36 = vld [vmem:[%s4132_s5 + $0x10] sm:$0xff] (!%p573_p2)  ;;  %v665_v38 = vld [vmem:[%s4132_s5 + $0x18] sm:$0xff] (!%p573_p2)  ;;  %v1030_v40 = vld [vmem:[%s4134_s7] sm:$0xff] (!%p573_p2)  ;;  %vm1054_vm1 = vcmask (!%p573_p2), 261120  }
   0xd   : > { %s4161_s25 = sld [smem:[#allocation3_spill]] (!%p573_p2)  ;;  %s4162_s1 = sld [smem:[#allocation4_spill]] (!%p573_p2)  ;;  %v1031_v42 = vld [vmem:[%s4134_s7 + $0x8] sm:$0xff] (!%p573_p2)  ;;  %v1156_v43 = vld [vmem:[%s4136_s9] sm:$0xff] (!%p573_p2)  ;;  %vm792_vm2 = vcmask (!%p573_p2), 130048   ;;  %vm1435_vm3 = vcmask (!%p573_p2), 64512  }
   0xe   : > { %v1157_v44 = vld [vmem:[%s4136_s9 + $0x8] sm:$0xff] (!%p573_p2)  ;;  %v1026_v45 = vld [vmem:[%s4133_s6] sm:$0xff] (!%p573_p2)  ;;  %vm3495_vm4 = vmmov (!%p573_p2), 0   ;;  %vm3832_vm5 = vmpackc.low (!%p573_p2), %vm792_vm2, %vm792_vm2  ;;  %s4167_s28 = sld [smem:[#allocation8_spill]] (!%p573_p2) }
   0xf   : > { %v1152_v46 = vld [vmem:[%s4135_s8] sm:$0xff] (!%p573_p2) }
  0x11   : > { %v650_v0 = vld [vmem:[%s4159_s2] sm:$0xff] (!%p573_p2)  ;;  %v651_v37 = vld [vmem:[%s4159_s2 + $0x8] sm:$0xff] (!%p573_p2)  ;;  %v652_v39 = vld [vmem:[%s4159_s2 + $0x10] sm:$0xff] (!%p573_p2) }
  0x12   : > { %3139 = vmatprep.mubr.msk.f32.mxu0 (!%p573_p2), %vm694_vm0, %v650_v0  ;;  %3161 = vmatprep.mubr.msk.f32.mxu1 (!%p573_p2), %vm694_vm0, %v650_v0  ;;  %v654_v1 = vld [vmem:[%s4160_s26] sm:$0xff] (!%p573_p2)  ;;  %v656_v2 = vld [vmem:[%s4160_s26 + $0x10] sm:$0xff] (!%p573_p2)  ;;  %v655_v4 = vld [vmem:[%s4160_s26 + $0x8] sm:$0xff] (!%p573_p2) }
  0x13   : > { %s4170_s22 = smov (!%p635_p3, %s2947_s22), 1  ;;  %676 = vperm.xlu0 %3429, %v654_v1   ;;  %686 = vperm.xlu1 %3430, %v656_v2   ;;  %v657_v5 = vld [vmem:[%s4160_s26 + $0x18] sm:$0xff] }
  0x14   : > { %s3016_s4 = sshll.u32 %s4170_s22, 6  ;;  %v653_v41 = vld [vmem:[%s4159_s2 + $0x18] sm:$0xff] }
  0x15   : > { %s3633_s3 = scalar_lea.vmem %s4161_s25, %s3016_s4  ;;  %s3638_s20 = scalar_lea.vmem %s4162_s1, %s3016_s4 }
  0x16   : > { %v666_v6 = vld [vmem:[%s3633_s3] sm:$0xff]  ;;  %v667_v7 = vld [vmem:[%s3633_s3 + $0x8] sm:$0xff]  ;;  %v668_v11 = vld [vmem:[%s3633_s3 + $0x10] sm:$0xff]  ;;  %s4163_s1 = sld [smem:[#allocation7_spill]]  ;;  %s3018_s25 = sshll.u32 %s4170_s22, 5 }
  0x17   : > { %v883_v8 = vld [vmem:[%s3638_s20] sm:$0xff]  ;;  %v3313_v9 = vpack.c.bf16 %v667_v7, %v666_v6  ;;  %v884_v10 = vld [vmem:[%s3638_s20 + $0x8] sm:$0xff]  ;;  %v669_v12 = vld [vmem:[%s3633_s3 + $0x18] sm:$0xff]  ;;  %681 = vperm.xlu0 %3429, %v655_v4   ;;  %691 = vperm.xlu1 %3430, %v657_v5  }
  0x18   : > { %v3329_v14 = vpack.c.bf16 %v884_v10, %v883_v8  ;;  %v3317_v15 = vpack.c.bf16 %v669_v12, %v668_v11  ;;  %v885_v16 = vld [vmem:[%s3638_s20 + $0x10] sm:$0xff]  ;;  %v886_v17 = vld [vmem:[%s3638_s20 + $0x18] sm:$0xff]  ;;  %v670_v18 = vld [vmem:[%s3633_s3 + $0x20] sm:$0xff] }
  0x19   : > { %3314 = vmatprep.subr.bf16.mxu0 %v3313_v9  ;;  %v3333_v19 = vpack.c.bf16 %v886_v17, %v885_v16  ;;  %v671_v20 = vld [vmem:[%s3633_s3 + $0x28] sm:$0xff]  ;;  %v887_v21 = vld [vmem:[%s3638_s20 + $0x20] sm:$0xff]  ;;  %v672_v26 = vld [vmem:[%s3633_s3 + $0x30] sm:$0xff] }
  0x1a   : > { %v888_v22 = vld [vmem:[%s3638_s20 + $0x28] sm:$0xff]  ;;  %3330 = vmatprep.subr.bf16.mxu1 %v3329_v14  ;;  %3316 = vmatpush3.bf16.msra.mxu0 %v3313_v9  ;;  %v3321_v24 = vpack.c.bf16 %v671_v20, %v670_v18  ;;  %v673_v27 = vld [vmem:[%s3633_s3 + $0x38] sm:$0xff]  ;;  %v889_v28 = vld [vmem:[%s3638_s20 + $0x30] sm:$0xff] }
  0x1b   : > { %3332 = vmatpush3.bf16.msra.mxu1 %v3329_v14  ;;  %3318 = vmatprep.subr.bf16.mxu0 %v3317_v15  ;;  %v3337_v25 = vpack.c.bf16 %v888_v22, %v887_v21  ;;  %v890_v29 = vld [vmem:[%s3638_s20 + $0x38] sm:$0xff]  ;;  %v3325_v32 = vpack.c.bf16 %v673_v27, %v672_v26  ;;  %s649_s20 = scalar_lea.vmem %s4167_s28, %s3018_s25 }
  0x1c   : > { %s4164_s4 = smov %s4163_s1  ;;  %v658_v13 = vld [vmem:[%s4163_s1] sm:$0xff]  ;;  %3334 = vmatprep.subr.bf16.mxu1 %v3333_v19  ;;  %v3341_v33 = vpack.c.bf16 %v890_v29, %v889_v28 }
  0x1d   : > { %v659_v23 = vld [vmem:[%s4164_s4 + $0x8] sm:$0xff]  ;;  %837 = vperm.xlu0 %3429, %v658_v13   ;;  %v660_v34 = vld [vmem:[%s4164_s4 + $0x10] sm:$0xff]  ;;  %v661_v35 = vld [vmem:[%s4164_s4 + $0x18] sm:$0xff] }
  0x1e   : > { %842 = vperm.xlu1 %3430, %v659_v23   ;;  %3320 = vmatpush3.bf16.msra.mxu0 %v3317_v15 }
  0x1f   : > { %3336 = vmatpush3.bf16.msra.mxu1 %v3333_v19  ;;  %3322 = vmatprep.subr.bf16.mxu0 %v3321_v24 }
  0x20   : > { %3338 = vmatprep.subr.bf16.mxu1 %v3337_v25 }
  0x21   : > { %861 = vperm.xlu0 %3429, %v662_v30  }
  0x22   : > { %866 = vperm.xlu1 %3430, %v663_v31   ;;  %3324 = vmatpush3.bf16.msra.mxu0 %v3321_v24 }
  0x23   : > { %3340 = vmatpush3.bf16.msra.mxu1 %v3337_v25  ;;  %3326 = vmatprep.subr.bf16.mxu0 %v3325_v32 }
  0x24   : > { %3342 = vmatprep.subr.bf16.mxu1 %v3341_v33 }
  0x25   : > { %847 = vperm.xlu0 %3429, %v660_v34  }
  0x26   : > { %852 = vperm.xlu1 %3430, %v661_v35   ;;  %3328 = vmatpush3.bf16.msra.mxu0 %v3325_v32 }
  0x27   : > { %3344 = vmatpush3.bf16.msra.mxu1 %v3341_v33 }
  0x29   : > { %871 = vperm.xlu0 %3429, %v664_v36   ;;  %3140 = vmatmul.mubr.msk.f32.vlgmr.msra.gmra.mrb[0].mxu0 %vm694_vm0, %v651_v37 }
  0x2a   : > { %876 = vperm.xlu1 %3430, %v665_v38   ;;  %3162 = vmatmul.mubr.msk.f32.vlgmr.msra.gmra.mrb[0].mxu1 %vm694_vm0, %v651_v37 }
  0x2b   : > { %3142 = vmatprep.mubr.msk.f32.mxu0 %vm694_vm0, %v652_v39  ;;  %3164 = vmatprep.mubr.msk.f32.mxu1 %vm694_vm0, %v652_v39 }
  0x2d   : > { %1036 = vperm.xlu0 %3429, %v1030_v40   ;;  %3143 = vmatmul.mubr.msk.f32.gmra.mrb[2].mxu0 %vm694_vm0, %v653_v41 }
  0x2e   : > { %1041 = vperm.xlu1 %3430, %v1031_v42   ;;  %3165 = vmatmul.mubr.msk.f32.gmra.mrb[2].mxu1 %vm694_vm0, %v653_v41 }
  0x2f   : > { %3175 = vmatprep.mubr.msk.f32.mxu0 %vm1054_vm1, %v1026_v45  ;;  %3189 = vmatprep.mubr.msk.f32.mxu1 %vm1054_vm1, %v1152_v46 }
  0x31   : > { %1162 = vperm.xlu0 %3429, %v1156_v43  }
  0x32   : > { %1167 = vperm.xlu1 %3430, %v1157_v44  }
  0x92   : > { %v677_v47 = vpop.permute.xlu0 %676  ;;  %v687_v48 = vpop.permute.xlu1 %686 }
  0x96   : > { %v682_v49 = vpop.permute.xlu0 %681  ;;  %v692_v59 = vpop.permute.xlu1 %691 }
  0xfc   : > { %v3141_v50 = vpop.f32.mrb[0].mxu0 }
  0xfd   : > { %v779_v51 = vadd.f32 %v3141_v50, %v682_v49  ;;  %v3163_v52 = vpop.f32.mrb[0].mxu1  ;;  %v773_v53 = vpop.f32.mrb[1].mxu0 }
  0xfe   : > { %v963_v54 = vadd.f32 %v3163_v52, %v682_v49  ;;  %v774_v55 = vadd.f32 %v773_v53, %v677_v47  ;;  %v957_v56 = vpop.f32.mrb[1].mxu1 }
  0xff   : > { %v794_v57 = vsel %vm792_vm2, %v779_v51, 0.0  ;;  %v958_v58 = vadd.f32 %v957_v56, %v677_v47 }
 0x100   : > { %v977_v60 = vsel %vm792_vm2, %v963_v54, 0.0  ;;  %v793_v61 = vsel %vm792_vm2, %v774_v55, 0.0  ;;  %v3144_v62 = vpop.f32.mrb[2].mxu0 }
 0x101   : > { %v795_v63 = vadd.f32 %v794_v57, %v793_v61  ;;  %v976_v0 = vsel %vm792_vm2, %v958_v58, 0.0  ;;  %v3166_v1 = vpop.f32.mrb[2].mxu1  ;;  %v783_v2 = vpop.f32.mrb[3].mxu0  ;;  %v789_v4 = vadd.f32 %v3144_v62, %v692_v59 }
 0x102   : > { %v978_v3 = vadd.f32 %v977_v60, %v976_v0  ;;  %v784_v5 = vadd.f32 %v783_v2, %v687_v48  ;;  %v967_v6 = vpop.f32.mrb[3].mxu1  ;;  %v973_v7 = vadd.f32 %v3166_v1, %v692_v59 }
 0x103   : > { %v968_v8 = vadd.f32 %v967_v6, %v687_v48  ;;  %v798_v12 = vsel %vm792_vm2, %v789_v4, 0.0 }
 0x104   : > { %v796_v9 = vsel %vm792_vm2, %v784_v5, 0.0  ;;  %v981_v14 = vsel %vm792_vm2, %v973_v7, 0.0 }
 0x105   : > { %v797_v10 = vadd.f32 %v796_v9, %v795_v63  ;;  %v979_v11 = vsel %vm792_vm2, %v968_v8, 0.0  ;;  %v838_v9 = vpop.permute.xlu0 %837 }
 0x106   : > { %v980_v13 = vadd.f32 %v979_v11, %v978_v3 }
 0x107   : > { %v799_v15 = vadd.f32 %v798_v12, %v797_v10  ;;  %v843_v10 = vpop.permute.xlu1 %842 }
 0x108   : > { %v982_v16 = vadd.f32 %v981_v14, %v980_v13 }
 0x109   : > { %v800_v17 = vrot.slane %v799_v15, 4 }
 0x10a   : > { %v983_v18 = vrot.slane %v982_v16, 4 }
 0x10b   : > { %v801_v19 = vadd.f32 %v800_v17, %v799_v15  ;;  %v862_v15 = vpop.permute.xlu0 %861 }
 0x10c   : > { %v984_v20 = vadd.f32 %v983_v18, %v982_v16  ;;  %v867_v16 = vpop.permute.xlu1 %866 }
 0x10d   : > { %v802_v21 = vrot.slane %v801_v19, 2 }
 0x10e   : > { %v985_v22 = vrot.slane %v984_v20, 2 }
 0x10f   : > { %v803_v23 = vadd.f32 %v802_v21, %v801_v19  ;;  %v848_v17 = vpop.permute.xlu0 %847 }
 0x110   : > { %v986_v24 = vadd.f32 %v985_v22, %v984_v20  ;;  %v853_v18 = vpop.permute.xlu1 %852 }
 0x111   : > { %v804_v25 = vrot.slane %v803_v23, 1 }
 0x112   : > { %v987_v26 = vrot.slane %v986_v24, 1 }
 0x113   : > { %v805_v27 = vadd.f32 %v804_v25, %v803_v23 }
 0x114   : > { %v988_v28 = vadd.f32 %v987_v26, %v986_v24 }
 0x115   : > { %v806_v29 = vmul.f32 0.03125, %v805_v27 }
 0x116   : > { %v989_v30 = vmul.f32 0.03125, %v988_v28 }
 0x117   : > { %v807_v31 = vsub.f32 %v774_v55, %v806_v29  ;;  %v808_v32 = vsub.f32 %v779_v51, %v806_v29  ;;  %v809_v33 = vsub.f32 %v784_v5, %v806_v29  ;;  %v810_v34 = vsub.f32 %v789_v4, %v806_v29 }
 0x118   : > { %v990_v35 = vsub.f32 %v958_v58, %v989_v30  ;;  %v991_v36 = vsub.f32 %v963_v54, %v989_v30  ;;  %v992_v37 = vsub.f32 %v968_v8, %v989_v30  ;;  %v993_v38 = vsub.f32 %v973_v7, %v989_v30 }
 0x119   : > { %v811_v39 = vmul.f32 %v807_v31, %v807_v31  ;;  %v812_v40 = vmul.f32 %v808_v32, %v808_v32  ;;  %v813_v41 = vmul.f32 %v809_v33, %v809_v33  ;;  %v814_v45 = vmul.f32 %v810_v34, %v810_v34 }
 0x11a   : > { %v994_v42 = vmul.f32 %v990_v35, %v990_v35  ;;  %v995_v43 = vmul.f32 %v991_v36, %v991_v36  ;;  %v996_v44 = vmul.f32 %v992_v37, %v992_v37  ;;  %v997_v49 = vmul.f32 %v993_v38, %v993_v38 }
 0x11b   : > { %v815_v46 = vsel %vm792_vm2, %v811_v39, 0.0  ;;  %v816_v47 = vsel %vm792_vm2, %v812_v40, 0.0  ;;  %v818_v52 = vsel %vm792_vm2, %v813_v41, 0.0  ;;  %v820_v56 = vsel %vm792_vm2, %v814_v45, 0.0  ;;  %v872_v41 = vpop.permute.xlu0 %871 }
 0x11c   : > { %v817_v48 = vadd.f32 %v816_v47, %v815_v46  ;;  %v998_v50 = vsel %vm792_vm2, %v994_v42, 0.0  ;;  %v999_v51 = vsel %vm792_vm2, %v995_v43, 0.0  ;;  %v1001_v55 = vsel %vm792_vm2, %v996_v44, 0.0  ;;  %v877_v42 = vpop.permute.xlu1 %876 }
 0x11d   : > { %v1000_v53 = vadd.f32 %v999_v51, %v998_v50  ;;  %v1003_v59 = vsel %vm792_vm2, %v997_v49, 0.0  ;;  %v1027_v51 = vld [vmem:[%s4133_s6 + $0x8] sm:$0xff] }
 0x11e   : > { %v819_v54 = vadd.f32 %v818_v52, %v817_v48  ;;  %v1153_v52 = vld [vmem:[%s4135_s8 + $0x8] sm:$0xff] }
 0x11f   : > { %v1002_v57 = vadd.f32 %v1001_v55, %v1000_v53  ;;  %v1154_v53 = vld [vmem:[%s4135_s8 + $0x10] sm:$0xff] }
 0x120   : > { %v821_v58 = vadd.f32 %v820_v56, %v819_v54  ;;  %v1037_v54 = vpop.permute.xlu0 %1036  ;;  %v1042_v55 = vpop.permute.xlu1 %1041 }
 0x121   : > { %v1004_v60 = vadd.f32 %v1003_v59, %v1002_v57 }
 0x122   : > { %v822_v61 = vrot.slane %v821_v58, 4 }
 0x123   : > { %v1005_v62 = vrot.slane %v1004_v60, 4 }
 0x124   : > { %v823_v63 = vadd.f32 %v822_v61, %v821_v58 }
 0x125   : > { %v1006_v0 = vadd.f32 %v1005_v62, %v1004_v60  ;;  %v1163_v60 = vpop.permute.xlu0 %1162 }
 0x126   : > { %v824_v1 = vrot.slane %v823_v63, 2 }
 0x127   : > { %v1007_v2 = vrot.slane %v1006_v0, 2 }
 0x128   : > { %v825_v3 = vadd.f32 %v824_v1, %v823_v63  ;;  %v1168_v1 = vpop.permute.xlu1 %1167 }
 0x129   : > { %v1008_v4 = vadd.f32 %v1007_v2, %v1006_v0 }
 0x12a   : > { %v826_v5 = vrot.slane %v825_v3, 1 }
 0x12b   : > { %v1009_v6 = vrot.slane %v1008_v4, 1 }
 0x12c   : > { %v827_v7 = vadd.f32 %v826_v5, %v825_v3  ;;  %v1028_v5 = vld [vmem:[%s4133_s6 + $0x10] sm:$0xff] }
 0x12d   : > { %v1010_v8 = vadd.f32 %v1009_v6, %v1008_v4  ;;  %v1155_v4 = vld [vmem:[%s4135_s8 + $0x18] sm:$0xff] }
 0x12e   : > { %v828_v11 = vmul.f32 0.03125, %v827_v7  ;;  %v1029_v6 = vld [vmem:[%s4133_s6 + $0x18] sm:$0xff]  ;;  %v1277_v7 = vld [vmem:[%s4137_s10] sm:$0xff] }
 0x12f   : > { %v1011_v12 = vmul.f32 0.03125, %v1010_v8  ;;  %v1278_v8 = vld [vmem:[%s4137_s10 + $0x8] sm:$0xff] }
 0x130   : > { %v829_v13 = vadd.f32 1e-05, %v828_v11 }
 0x131   : > { %v1012_v14 = vadd.f32 1e-05, %v1011_v12 }
 0x132   : > { %3431 = vrsqrt.f32 %v829_v13 }
 0x133   : > { %3433 = vrsqrt.f32 %v1012_v14 }
 0x13c   : > { %v3432_v19 = vpop.eup %3431 }
 0x13d   : > { %v3434_v20 = vpop.eup %3433  ;;  %v833_v21 = vmul.f32 %v3432_v19, %v809_v33  ;;  %v831_v22 = vmul.f32 %v3432_v19, %v807_v31  ;;  %v832_v23 = vmul.f32 %v3432_v19, %v808_v32  ;;  %v834_v24 = vmul.f32 %v3432_v19, %v810_v34 }
 0x13e   : > { %v1016_v25 = vmul.f32 %v3434_v20, %v992_v37  ;;  %v1014_v26 = vmul.f32 %v3434_v20, %v990_v35  ;;  %v1015_v27 = vmul.f32 %v3434_v20, %v991_v36  ;;  %v1017_v28 = vmul.f32 %v3434_v20, %v993_v38 }
 0x13f   : > { %v857_v29 = vmul.f32 %v848_v17, %v833_v21  ;;  %v855_v30 = vmul.f32 %v838_v9, %v831_v22  ;;  %v856_v39 = vmul.f32 %v843_v10, %v832_v23  ;;  %v858_v40 = vmul.f32 %v853_v18, %v834_v24  ;;  %v1032_v23 = vld [vmem:[%s4134_s7 + $0x10] sm:$0xff]  ;;  %v1281_v24 = vld [vmem:[%s4138_s11] sm:$0xff] }
 0x140   : > { %v1020_v43 = vmul.f32 %v1016_v25, %v848_v17  ;;  %v1018_v44 = vmul.f32 %v1014_v26, %v838_v9  ;;  %v1019_v45 = vmul.f32 %v1015_v27, %v843_v10  ;;  %v1021_v46 = vmul.f32 %v1017_v28, %v853_v18 }
 0x141   : > { %v3731_v47 = vadd.f32 %v862_v15, %v855_v30  ;;  %v3733_v33 = vadd.f32 %v867_v16, %v856_v39  ;;  %v3735_v31 = vadd.f32 %v872_v41, %v857_v29  ;;  %v3737_v32 = vadd.f32 %v877_v42, %v858_v40  ;;  %v1033_v29 = vld [vmem:[%s4134_s7 + $0x18] sm:$0xff] }
 0x142   : > { %v1024_v34 = vadd.f32 %v1020_v43, %v872_v41  ;;  %v1022_v35 = vadd.f32 %v1018_v44, %v862_v15  ;;  %v1023_v36 = vadd.f32 %v1019_v45, %v867_v16  ;;  %v1025_v37 = vadd.f32 %v1021_v46, %v877_v42 }
 0x143   : > { %v3345_v38 = vpack.c.bf16 %v3733_v33, %v3731_v47  ;;  %v3349_v50 = vpack.c.bf16 %v3737_v32, %v3735_v31 }
 0x144   : > { %v3353_v48 = vpack.c.bf16 %v1023_v36, %v1022_v35  ;;  %v3357_v49 = vpack.c.bf16 %v1025_v37, %v1024_v34 }
 0x145   : > { %3346 = vmatprep.subr.bf16.mxu0 %v3345_v38 }
 0x146   : > { %3354 = vmatprep.subr.bf16.mxu1 %v3353_v48  ;;  %3348 = vmatpush3.bf16.msra.mxu0 %v3345_v38 }
 0x147   : > { %3356 = vmatpush3.bf16.msra.mxu1 %v3353_v48  ;;  %3350 = vmatprep.subr.bf16.mxu0 %v3349_v50 }
 0x148   : > { %3358 = vmatprep.subr.bf16.mxu1 %v3357_v49 }
 0x14a   : > { %3352 = vmatpush3.bf16.msra.mxu0 %v3349_v50  ;;  %v1158_v50 = vld [vmem:[%s4136_s9 + $0x10] sm:$0xff] }
 0x14b   : > { %3360 = vmatpush3.bf16.msra.mxu1 %v3357_v49  ;;  %3362 = vmatprep.subr.bf16.mxu0 %v3353_v48 }
 0x14d   : > { %3176 = vmatmul.mubr.msk.f32.vlgmr.msra.gmra.mrb[4].mxu0 %vm1054_vm1, %v1027_v51  ;;  %v1282_v51 = vld [vmem:[%s4138_s11 + $0x8] sm:$0xff] }
 0x14e   : > { %3190 = vmatmul.mubr.msk.f32.vlgmr.msra.gmra.mrb[4].mxu1 %vm1054_vm1, %v1153_v52  ;;  %3364 = vmatpush3.bf16.msra.mxu0 %v3353_v48  ;;  %v3494_v52 = vmov 0.0|0.0  }
 0x14f   : > { %3366 = vmatprep.subr.bf16.mxu0 %v3357_v49  ;;  %3192 = vmatprep.mubr.msk.f32.mxu1 %vm1054_vm1, %v1154_v53 }
 0x150   : > { %3178 = vmatprep.mubr.msk.f32.mxu0 %vm1054_vm1, %v1028_v5 }
 0x151   : > { %3179 = vmatmul.mubr.msk.f32.gmra.mrb[6].mxu0 %vm1054_vm1, %v1029_v6 }
 0x152   : > { %3368 = vmatpush3.bf16.msra.mxu0 %v3357_v49  ;;  %3193 = vmatmul.mubr.msk.f32.gmra.mrb[6].mxu1 %vm1054_vm1, %v1155_v4 }
 0x153   : > { %3203 = vmatprep.mubr.msk.f32.mxu0 %vm1054_vm1, %v1277_v7  ;;  %3369 = vmatprep.subr.bf16.mxu0 %v3494_v52 }
 0x155   : > { %3204 = vmatmul.mubr.msk.f32.vlgmr.msra.gmra.mrb[8].mxu0 %vm1054_vm1, %v1278_v8 }
 0x220   : > { %v3177_v56 = vpop.f32.mrb[4].mxu0 }
 0x221   : > { %v1139_v57 = vadd.f32 %v3177_v56, %v1042_v55  ;;  %v3191_v58 = vpop.f32.mrb[4].mxu1  ;;  %v1133_v59 = vpop.f32.mrb[5].mxu0  ;;  %v1280_v55 = vld [vmem:[%s4137_s10 + $0x18] sm:$0xff]  ;;  %v3496_v56 = vmov 0.0  }
 0x222   : > { %v1134_v61 = vadd.f32 %v1133_v59, %v1037_v54  ;;  %v1258_v62 = vpop.f32.mrb[5].mxu1  ;;  %v1264_v3 = vadd.f32 %v3191_v58, %v1168_v1  ;;  %v1279_v54 = vld [vmem:[%s4137_s10 + $0x10] sm:$0xff] }
 0x223   : > { %v1618_v63 = vmul.f32 0.35355338, %v1139_v57  ;;  %v1259_v0 = vadd.f32 %v1258_v62, %v1163_v60  ;;  %3206 = vmatprep.mubr.msk.f32.mxu0 %vm1054_vm1, %v1279_v54 }
 0x224   : > { %v1402_v2 = vmul.f32 0.35355338, %v1134_v61  ;;  %v3180_v25 = vpop.f32.mrb[6].mxu0  ;;  %3207 = vmatmul.mubr.msk.f32.gmra.mrb[10].mxu0 %vm1054_vm1, %v1280_v55 }
 0x225   : > { %3209 = vmatprep.subr.mxu1 %v1259_v0  ;;  %1619 = vxpose.xlu1.b32.start.end [1/1] (short) (narrow) %v1618_v63, 16  ;;  %v3779_v13 = vpop.f32.mrb[6].mxu1  ;;  %v1143_v26 = vpop.f32.mrb[7].mxu0  ;;  %v1159_v63 = vld [vmem:[%s4136_s9 + $0x18] sm:$0xff] }
 0x226   : > { %3210 = vmatpush3.msra.mxu1 %v1259_v0  ;;  %1403 = vxpose.xlu0.b32.start.end [1/1] (short) (narrow) %v1402_v2, 16  ;;  %v3781_v14 = vpop.f32.mrb[7].mxu1 }
 0x227   : > { %3221 = vmatprep.subr.mxu1 %v1264_v3  ;;  %3218 = vmatprep.mubr.msk.f32.mxu0 %vm3495_vm4, %v3496_v56 }
 0x228   : > { %v3793_v27 = vpop.f32.mrb[8].mxu0 }
 0x229   : > { %v3795_v28 = vpop.f32.mrb[9].mxu0 }
 0x2a5   : > { %v1635_v10 = vpop.trf.xlu1 }
 0x2a6   : > { %v1419_v9 = vpop.trf.xlu0 }
 0x2a7   : > { %3211 = vmatprep.mubr.msk.f32.mxu1 %vm1435_vm3, %v1419_v9 }
 0x2a9   : > { %v1636_v12 = vpop.trf.xlu1 }
 0x2aa   : > { %v1420_v11 = vpop.trf.xlu0 }
 0x2ab   : > { %3212 = vmatmul.mubr.msk.f32.vlgmr.msra.gmra.mrb[8].mxu1 %vm1435_vm3, %v1420_v11  ;;  %v2264_v11 = vld [vmem:[%s4139_s12 + $0x8] sm:$0xff] }
 0x2ac   : > { %3222 = vmatpush3.msra.mxu1 %v1264_v3  ;;  %3223 = vmatprep.mubr.msk.f32.mxu1 %vm1435_vm3, %v1635_v10 }
 0x2ad   : > { %3373 = vmatprep.subr.bf16.mxu1 %v3494_v52 }
 0x2af   : > { %3224 = vmatmul.mubr.msk.f32.vlgmr.msra.gmra.mrb[10].mxu1 %vm1435_vm3, %v1636_v12 }
 0x2b0   : > { %3230 = vmatprep.mubr.msk.f32.mxu1 %vm3495_vm4, %v3496_v56 }
 0x37e   : > { %v3213_v15 = vpop.f32.mrb[8].mxu1 }
 0x37f   : > { %v1508_v16 = vpop.f32.mrb[9].mxu1  ;;  %v1520_v17 = vsel %vm792_vm2, %v3213_v15, -inf }
 0x380   : > { %1521 = vmax.xlane.f32.xlu1 %v1520_v17  ;;  %v1517_v18 = vsel %vm792_vm2, %v1508_v16, -inf }
 0x381   : > { %1518 = vmax.xlane.f32.xlu0 %v1517_v18 }
 0x382   : > { %v3225_v19 = vpop.f32.mrb[10].mxu1 }
 0x383   : > { %v1723_v20 = vpop.f32.mrb[11].mxu1  ;;  %v1735_v22 = vsel %vm792_vm2, %v3225_v19, -inf }
 0x384   : > { %v1732_v21 = vsel %vm792_vm2, %v1723_v20, -inf }
 0x385   : > { %1733 = vmax.xlane.f32.xlu0 %v1732_v21 }
 0x389   : > { %1736 = vmax.xlane.f32.xlu0 %v1735_v22 }
 0x391   : > { %1046 = vperm.xlu1 %3430, %v1032_v23  }
 0x395   : > { %1287 = vperm.xlu1 %3430, %v1281_v24  }
 0x39f   : > { %1051 = vperm.xlu0 %3429, %v1033_v29  }
 0x40d   : > { %v1522_v30 = vpop.xlane.xlu1 %1521 }
 0x40e   : > { %v1524_v39 = vsub.f32 %v3213_v15, %v1522_v30  ;;  %v1519_v40 = vpop.xlane.xlu0 %1518 }
 0x40f   : > { %v1523_v41 = vsub.f32 %v1508_v16, %v1519_v40  ;;  %v3855_v40 = vpop.f32.mrb[10].mxu0 }
 0x410   : > { %v1527_v42 = vmul.f32 1.442695, %v1524_v39 }
 0x411   : > { %v1525_v43 = vmul.f32 1.442695, %v1523_v41  ;;  %v1047_v59 = vpop.permute.xlu1 %1046 }
 0x412   : > { %3435 = vpow2.f32 %v1527_v42  ;;  %v1734_v44 = vpop.xlane.xlu0 %1733  ;;  %v1144_v61 = vadd.f32 %v1143_v26, %v1047_v59 }
 0x413   : > { %3437 = vpow2.f32 %v1525_v43  ;;  %v1738_v53 = vsub.f32 %v1723_v20, %v1734_v44 }
 0x414   : > { %v1833_v62 = vmul.f32 0.35355338, %v1144_v61 }
 0x415   : > { %v1740_v57 = vmul.f32 1.442695, %v1738_v53  ;;  %v1288_v3 = vpop.permute.xlu1 %1287 }
 0x416   : > { %v1737_v45 = vpop.xlane.xlu0 %1736  ;;  %v1384_v16 = vadd.f32 %v3795_v28, %v1288_v3 }
 0x417   : > { %v1739_v46 = vsub.f32 %v3225_v19, %v1737_v45 }
 0x419   : > { %v1742_v34 = vmul.f32 1.442695, %v1739_v46 }
 0x41b   : > { %3439 = vpow2.f32 %v1742_v34 }
 0x41c   : > { %v3436_v35 = vpop.eup %3435  ;;  %3441 = vpow2.f32 %v1740_v57 }
 0x41d   : > { %v3438_v36 = vpop.eup %3437  ;;  %v1532_v37 = vsel %vm792_vm2, %v3436_v35, 0.0 }
 0x41e   : > { %1533 = vadd.xlane.f32.xlu0 %v1532_v37  ;;  %v1529_v38 = vsel %vm792_vm2, %v3438_v36, 0.0  ;;  %v1052_v0 = vpop.permute.xlu0 %1051 }
 0x41f   : > { %1530 = vadd.xlane.f32.xlu1 %v1529_v38  ;;  %v1149_v1 = vadd.f32 %v3180_v25, %v1052_v0 }
 0x421   : > { %v2048_v2 = vmul.f32 0.35355338, %v1149_v1 }
 0x425   : > { %v3802_v48 = vpop.eup %3439 }
 0x426   : > { %v1747_v49 = vsel %vm792_vm2, %v3802_v48, 0.0  ;;  %v3442_v58 = vpop.eup %3441 }
 0x427   : > { %1748 = vadd.xlane.f32.xlu0 %v1747_v49  ;;  %v1744_v60 = vsel %vm792_vm2, %v3442_v58, 0.0 }
 0x430   : > { %1172 = vperm.xlu1 %3430, %v1158_v50  }
 0x43d   : > { %1292 = vperm.xlu0 %3429, %v1282_v51  }
 0x454   : > { %1745 = vadd.xlane.f32.xlu1 %v1744_v60 }
 0x45b   : > { %1834 = vxpose.xlu0.b32.start.end [1/1] (short) (narrow) %v1833_v62, 16 }
 0x465   : > { %1177 = vperm.xlu1 %3430, %v1159_v63  }
 0x48e   : > { %2049 = vxpose.xlu1.b32.start.end [1/1] (short) (narrow) %v2048_v2, 16 }
 0x4ab   : > { %v1534_v4 = vpop.xlane.xlu0 %1533 }
 0x4ac   : > { %3443 = vrcp.f32 %v1534_v4  ;;  %v1531_v5 = vpop.xlane.xlu1 %1530 }
 0x4ad   : > { %3445 = vrcp.f32 %v1531_v5  ;;  %v1283_v5 = vld [vmem:[%s4138_s11 + $0x10] sm:$0xff] }
 0x4b0   : > { %v1173_v10 = vpop.permute.xlu1 %1172 }
 0x4b1   : > { %v1269_v15 = vadd.f32 %v3781_v14, %v1173_v10  ;;  %v2269_v10 = vld [vmem:[%s4140_s13 + $0x10] sm:$0xff] }
 0x4b4   : > { %v1749_v17 = vpop.xlane.xlu0 %1748 }
 0x4b5   : > { %3447 = vrcp.f32 %v1749_v17  ;;  %v2396_v17 = vld [vmem:[%s4142_s15] sm:$0xff] }
 0x4b6   : > { %v3444_v6 = vpop.eup %3443 }
 0x4b7   : > { %v3446_v7 = vpop.eup %3445  ;;  %v1538_v8 = vmul.f32 %v3444_v6, %v3436_v35  ;;  %v2267_v6 = vld [vmem:[%s4140_s13] sm:$0xff] }
 0x4b8   : > { %v1537_v9 = vmul.f32 %v3446_v7, %v3438_v36  ;;  %v2268_v7 = vld [vmem:[%s4140_s13 + $0x8] sm:$0xff] }
 0x4ba   : > { %v3370_v12 = vpack.c.bf16 %v1538_v8, %v1537_v9  ;;  %v1284_v8 = vld [vmem:[%s4138_s11 + $0x18] sm:$0xff] }
 0x4bb   : > { %v2270_v9 = vld [vmem:[%s4140_s13 + $0x18] sm:$0xff] }
 0x4bc   : > { %3372 = vmatpush3.bf16.xpose.msk.msra.mxu0 %vm3832_vm5, %v3370_v12  ;;  %v1293_v18 = vpop.permute.xlu0 %1292  ;;  %v2393_v12 = vld [vmem:[%s4141_s14 + $0x8] sm:$0xff] }
 0x4bd   : > { %3233 = vmatprep.subr.mxu0 %v1269_v15  ;;  %v1389_v29 = vadd.f32 %v3793_v27, %v1293_v18  ;;  %v2395_v18 = vld [vmem:[%s4141_s14 + $0x18] sm:$0xff] }
 0x4bf   : > { %v3448_v21 = vpop.eup %3447 }
 0x4c0   : > { %v1753_v23 = vmul.f32 %v3448_v21, %v3802_v48  ;;  %v2499_v21 = vld [vmem:[%s4144_s17 + $0x8] sm:$0xff] }
 0x4c3   : > { %3219 = vmatmul.mubr.msk.f32.vlgmr.msra.gmra.mrb[12].mxu0 %vm792_vm2, %v1384_v16  ;;  %v2397_v16 = vld [vmem:[%s4142_s15 + $0x8] sm:$0xff] }
 0x4c4   : > { %3234 = vmatpush3.msra.mxu0 %v1269_v15  ;;  %v2392_v15 = vld [vmem:[%s4141_s14] sm:$0xff] }
 0x4c5   : > { %3377 = vmatprep.subr.bf16.mxu0 %v3494_v52 }
 0x4db   : > { %v1850_v19 = vpop.trf.xlu0 }
 0x4dc   : > { %3235 = vmatprep.mubr.msk.f32.mxu0 %vm1435_vm3, %v1850_v19  ;;  %v2394_v19 = vld [vmem:[%s4141_s14 + $0x10] sm:$0xff] }
 0x4df   : > { %v1851_v20 = vpop.trf.xlu0 }
 0x4e0   : > { %3236 = vmatmul.mubr.msk.f32.vlgmr.msra.gmra.mrb[14].mxu0 %vm1435_vm3, %v1851_v20  ;;  %v2399_v20 = vld [vmem:[%s4142_s15 + $0x18] sm:$0xff] }
 0x4e1   : > { %v1746_v14 = vpop.xlane.xlu1 %1745  ;;  %3242 = vmatprep.mubr.msk.f32.mxu0 %vm3495_vm4, %v3496_v56 }
 0x4e2   : > { %3449 = vrcp.f32 %v1746_v14  ;;  %v2398_v14 = vld [vmem:[%s4142_s15 + $0x10] sm:$0xff] }
 0x4e5   : > { %v1178_v25 = vpop.permute.xlu1 %1177 }
 0x4e6   : > { %v1274_v28 = vadd.f32 %v3779_v13, %v1178_v25  ;;  %v3859_v13 = vpop.f32.mrb[11].mxu0  ;;  %v2503_v25 = vld [vmem:[%s4144_s17 + $0x28] sm:$0xff] }
 0x4ec   : > { %v3450_v22 = vpop.eup %3449 }
 0x4ed   : > { %v1752_v24 = vmul.f32 %v3450_v22, %v3442_v58  ;;  %v2498_v22 = vld [vmem:[%s4144_s17] sm:$0xff] }
 0x4ef   : > { %v3374_v26 = vpack.c.bf16 %v1753_v23, %v1752_v24  ;;  %v2501_v23 = vld [vmem:[%s4144_s17 + $0x18] sm:$0xff]  ;;  %v2500_v24 = vld [vmem:[%s4144_s17 + $0x10] sm:$0xff] }
 0x4f1   : > { %3376 = vmatpush3.bf16.xpose.msk.msra.mxu1 %vm3832_vm5, %v3374_v26  ;;  %v2502_v26 = vld [vmem:[%s4144_s17 + $0x20] sm:$0xff] }
 0x4f2   : > { %3245 = vmatprep.subr.mxu1 %v1274_v28 }
 0x4f8   : > { %3231 = vmatmul.mubr.msk.f32.vlgmr.msra.gmra.mrb[12].mxu1 %vm792_vm2, %v1389_v29  ;;  %v2504_v29 = vld [vmem:[%s4144_s17 + $0x30] sm:$0xff] }
 0x4f9   : > { %3246 = vmatpush3.msra.mxu1 %v1274_v28  ;;  %v2505_v28 = vld [vmem:[%s4144_s17 + $0x38] sm:$0xff] }
 0x4fa   : > { %3381 = vmatprep.subr.bf16.mxu1 %v3494_v52 }
 0x50e   : > { %v2065_v30 = vpop.trf.xlu1 }
 0x50f   : > { %3247 = vmatprep.mubr.msk.f32.mxu1 %vm1435_vm3, %v2065_v30  ;;  %v2752_v30 = vld [vmem:[%s4146_s19 + $0x8] sm:$0xff] }
 0x512   : > { %v2066_v39 = vpop.trf.xlu1 }
 0x513   : > { %3248 = vmatmul.mubr.msk.f32.vlgmr.msra.gmra.mrb[14].mxu1 %vm1435_vm3, %v2066_v39  ;;  %v2751_v39 = vld [vmem:[%s4146_s19] sm:$0xff] }
 0x514   : > { %3254 = vmatprep.mubr.msk.f32.mxu1 %vm3495_vm4, %v3496_v56 }
 0x596   : > { %v1614_v41 = vpop.f32.mrb[12].mxu0 }
 0x597   : > { %v3220_v27 = vpop.f32.mrb[13].mxu0 }
 0x598   : > { %v2753_v27 = vld [vmem:[%s4146_s19 + $0x10] sm:$0xff] }
 0x5b3   : > { %v3237_v42 = vpop.f32.mrb[14].mxu0 }
 0x5b4   : > { %v1938_v43 = vpop.f32.mrb[15].mxu0  ;;  %v1950_v44 = vsel %vm792_vm2, %v3237_v42, -inf }
 0x5b5   : > { %1951 = vmax.xlane.f32.xlu1 %v1950_v44  ;;  %v1947_v45 = vsel %vm792_vm2, %v1938_v43, -inf }
 0x5b6   : > { %1948 = vmax.xlane.f32.xlu0 %v1947_v45 }
 0x5cb   : > { %v1829_v46 = vpop.f32.mrb[12].mxu1 }
 0x5cc   : > { %v3863_v34 = vpack.c.bf16 %v1829_v46, %v1614_v41  ;;  %v3232_v35 = vpop.f32.mrb[13].mxu1  ;;  %v2754_v41 = vld [vmem:[%s4146_s19 + $0x18] sm:$0xff] }
 0x5e6   : > { %v3249_v36 = vpop.f32.mrb[14].mxu1 }
 0x5e7   : > { %v2153_v37 = vpop.f32.mrb[15].mxu1  ;;  %v2165_v48 = vsel %vm792_vm2, %v3249_v36, -inf }
 0x5e8   : > { %v2162_v38 = vsel %vm792_vm2, %v2153_v37, -inf }
 0x5e9   : > { %2163 = vmax.xlane.f32.xlu0 %v2162_v38 }
 0x5ed   : > { %2166 = vmax.xlane.f32.xlu0 %v2165_v48 }
 0x642   : > { %v1952_v49 = vpop.xlane.xlu1 %1951 }
 0x643   : > { %v1954_v50 = vsub.f32 %v3237_v42, %v1952_v49  ;;  %v1949_v51 = vpop.xlane.xlu0 %1948 }
 0x644   : > { %v1953_v52 = vsub.f32 %v1938_v43, %v1949_v51 }
 0x645   : > { %v1957_v53 = vmul.f32 1.442695, %v1954_v50 }
 0x646   : > { %v1955_v54 = vmul.f32 1.442695, %v1953_v52 }
 0x647   : > { %3451 = vpow2.f32 %v1957_v53 }
 0x648   : > { %3453 = vpow2.f32 %v1955_v54 }
 0x651   : > { %v3867_v55 = vpop.eup %3451 }
 0x652   : > { %v3869_v56 = vpop.eup %3453  ;;  %v1962_v57 = vsel %vm792_vm2, %v3867_v55, 0.0 }
 0x653   : > { %1963 = vadd.xlane.f32.xlu0 %v1962_v57  ;;  %v1959_v58 = vsel %vm792_vm2, %v3869_v56, 0.0 }
 0x654   : > { %1960 = vadd.xlane.f32.xlu1 %v1959_v58 }
 0x676   : > { %v2164_v59 = vpop.xlane.xlu0 %2163 }
 0x677   : > { %v2168_v60 = vsub.f32 %v2153_v37, %v2164_v59 }
 0x679   : > { %v2170_v61 = vmul.f32 1.442695, %v2168_v60 }
 0x67a   : > { %v2167_v62 = vpop.xlane.xlu0 %2166 }
 0x67b   : > { %3455 = vpow2.f32 %v2170_v61  ;;  %v2169_v63 = vsub.f32 %v3249_v36, %v2167_v62  ;;  %v2266_v61 = vld [vmem:[%s4139_s12 + $0x18] sm:$0xff]  ;;  %v2490_v62 = vld [vmem:[%s4143_s16] sm:$0xff] }
 0x67d   : > { %v2172_v0 = vmul.f32 1.442695, %v2169_v63 }
 0x67f   : > { %3457 = vpow2.f32 %v2172_v0 }
 0x685   : > { %v3875_v1 = vpop.eup %3455 }
 0x686   : > { %v2174_v2 = vsel %vm792_vm2, %v3875_v1, 0.0 }
 0x687   : > { %2175 = vadd.xlane.f32.xlu1 %v2174_v2 }
 0x689   : > { %v3879_v3 = vpop.eup %3457 }
 0x68a   : > { %v2177_v4 = vsel %vm792_vm2, %v3879_v3, 0.0 }
 0x68b   : > { %2178 = vadd.xlane.f32.xlu0 %v2177_v4 }
 0x698   : > { %1297 = vperm.xlu1 %3430, %v1283_v5  }
 0x69c   : > { %2273 = vperm.xlu1 %3430, %v2267_v6  }
 0x6a0   : > { %2278 = vperm.xlu1 %3430, %v2268_v7  }
 0x6a1   : > { %1302 = vperm.xlu0 %3429, %v1284_v8  }
 0x6a4   : > { %2288 = vperm.xlu1 %3430, %v2270_v9  }
 0x6a5   : > { %2283 = vperm.xlu0 %3429, %v2269_v10  }
 0x6a8   : > { %2449 = vperm.xlu1 %3430, %v2393_v12  }
 0x6a9   : > { %2444 = vperm.xlu0 %3429, %v2392_v15  }
 0x6ac   : > { %2473 = vperm.xlu1 %3430, %v2397_v16  }
 0x6ad   : > { %2468 = vperm.xlu0 %3429, %v2396_v17  }
 0x6b0   : > { %2459 = vperm.xlu1 %3430, %v2395_v18  }
 0x6b1   : > { %2454 = vperm.xlu0 %3429, %v2394_v19  }
 0x6b4   : > { %2483 = vperm.xlu1 %3430, %v2399_v20  }
 0x6b5   : > { %2478 = vperm.xlu0 %3429, %v2398_v14  }
 0x6b8   : > { %2513 = vperm.xlu1 %3430, %v2499_v21  }
 0x6b9   : > { %2508 = vperm.xlu0 %3429, %v2498_v22  }
 0x6bc   : > { %2523 = vperm.xlu1 %3430, %v2501_v23  }
 0x6bd   : > { %2518 = vperm.xlu0 %3429, %v2500_v24  }
 0x6c0   : > { %2533 = vperm.xlu1 %3430, %v2503_v25  }
 0x6c1   : > { %2528 = vperm.xlu0 %3429, %v2502_v26  }
 0x6c4   : > { %2543 = vperm.xlu1 %3430, %v2505_v28  }
 0x6c5   : > { %2538 = vperm.xlu0 %3429, %v2504_v29  }
 0x6c8   : > { %2762 = vperm.xlu1 %3430, %v2752_v30  }
 0x6c9   : > { %2757 = vperm.xlu0 %3429, %v2751_v39  }
 0x6cc   : > { %2772 = vperm.xlu1 %3430, %v2754_v41  }
 0x6cd   : > { %2767 = vperm.xlu0 %3429, %v2753_v27  }
 0x6e0   : > { %v1964_v42 = vpop.xlane.xlu0 %1963 }
 0x6e1   : > { %3459 = vrcp.f32 %v1964_v42  ;;  %v1961_v43 = vpop.xlane.xlu1 %1960 }
 0x6e2   : > { %3461 = vrcp.f32 %v1961_v43 }
 0x6eb   : > { %v3460_v44 = vpop.eup %3459 }
 0x6ec   : > { %v3462_v45 = vpop.eup %3461  ;;  %v1968_v46 = vmul.f32 %v3460_v44, %v3867_v55 }
 0x6ed   : > { %v1967_v35 = vmul.f32 %v3462_v45, %v3869_v56 }
 0x6ef   : > { %v3378_v36 = vpack.c.bf16 %v1968_v46, %v1967_v35 }
 0x6f1   : > { %3380 = vmatpush3.bf16.xpose.msk.msra.mxu0 %vm3832_vm5, %v3378_v36 }
 0x6f2   : > { %3386 = vmatprep.subr.bf16.mxu0 %v3863_v34 }
 0x714   : > { %v2176_v37 = vpop.xlane.xlu1 %2175 }
 0x715   : > { %3463 = vrcp.f32 %v2176_v37 }
 0x718   : > { %v1298_v38 = vpop.permute.xlu1 %1297  ;;  %v2179_v48 = vpop.xlane.xlu0 %2178 }
 0x719   : > { %v1394_v49 = vadd.f32 %v3859_v13, %v1298_v38  ;;  %3465 = vrcp.f32 %v2179_v48  ;;  %v2263_v13 = vld [vmem:[%s4139_s12] sm:$0xff] }
 0x71b   : > { %3243 = vmatmul.mubr.msk.f32.vlgmr.msra.gmra.mrb[16].mxu0 %vm792_vm2, %v1394_v49 }
 0x71c   : > { %3388 = vmatpush3.bf16.msra.mxu0 %v3863_v34  ;;  %3265 = vmatprep.mubr.msk.f32.mxu0 %vm1054_vm1, %v2263_v13  ;;  %v2274_v63 = vpop.permute.xlu1 %2273 }
 0x71f   : > { %v3464_v50 = vpop.eup %3463 }
 0x720   : > { %v2182_v52 = vmul.f32 %v3464_v50, %v3875_v1  ;;  %v1303_v55 = vpop.permute.xlu0 %1302  ;;  %v2279_v0 = vpop.permute.xlu1 %2278 }
 0x721   : > { %v1399_v56 = vadd.f32 %v3855_v40, %v1303_v55  ;;  %v2265_v40 = vld [vmem:[%s4139_s12 + $0x10] sm:$0xff] }
 0x723   : > { %v3466_v51 = vpop.eup %3465 }
 0x724   : > { %v2183_v53 = vmul.f32 %v3466_v51, %v3879_v3  ;;  %v2289_v6 = vpop.permute.xlu1 %2288  ;;  %v2284_v9 = vpop.permute.xlu0 %2283 }
 0x726   : > { %v3382_v54 = vpack.c.bf16 %v2183_v53, %v2182_v52 }
 0x728   : > { %3384 = vmatpush3.bf16.xpose.msk.msra.mxu1 %vm3832_vm5, %v3382_v54  ;;  %v2450_v54 = vpop.permute.xlu1 %2449  ;;  %v2445_v55 = vpop.permute.xlu0 %2444 }
 0x72f   : > { %3255 = vmatmul.mubr.msk.f32.vlgmr.msra.gmra.mrb[16].mxu1 %vm792_vm2, %v1399_v56 }
 0x730   : > { %3279 = vmatprep.mubr.msk.f32.mxu1 %vm1054_vm1, %v2490_v62 }
 0x7ee   : > { %v2044_v34 = vpop.f32.mrb[16].mxu0 }
 0x7ef   : > { %v3244_v57 = vpop.f32.mrb[17].mxu0 }
 0x7f0   : > { %v2469_v57 = vpop.permute.xlu0 %2468 }
 0x802   : > { %v2259_v58 = vpop.f32.mrb[16].mxu1 }
 0x803   : > { %v3389_v59 = vpack.c.bf16 %v2259_v58, %v2044_v34  ;;  %v3256_v60 = vpop.f32.mrb[17].mxu1  ;;  %v2474_v34 = vpop.permute.xlu1 %2473 }
 0x805   : > { %3390 = vmatprep.subr.bf16.mxu0 %v3389_v59 }
 0x806   : > { %3392 = vmatpush3.bf16.msra.mxu0 %v3389_v59  ;;  %v2455_v59 = vpop.permute.xlu0 %2454 }
 0x807   : > { %v2460_v58 = vpop.permute.xlu1 %2459 }
 0x809   : > { %3266 = vmatmul.mubr.msk.f32.vlgmr.msra.gmra.mrb[18].mxu0 %vm1054_vm1, %v2264_v11 }
 0x80a   : > { %3268 = vmatprep.mubr.msk.f32.mxu0 %vm1054_vm1, %v2265_v40 }
 0x80d   : > { %3269 = vmatmul.mubr.msk.f32.gmra.mrb[20].mxu0 %vm1054_vm1, %v2266_v61 }
 0x8dc   : > { %v3267_v1 = vpop.f32.mrb[18].mxu0 }
 0x8dd   : > { %v2375_v2 = vadd.f32 %v3267_v1, %v2279_v0  ;;  %v2369_v3 = vpop.f32.mrb[19].mxu0 }
 0x8de   : > { %v2370_v4 = vadd.f32 %v2369_v3, %v2274_v63  ;;  %v2484_v3 = vpop.permute.xlu1 %2483 }
 0x8df   : > { %v2389_v5 = vadd.f32 %v2375_v2, %v3733_v33 }
 0x8e0   : > { %v2388_v7 = vadd.f32 %v2370_v4, %v3731_v47  ;;  %v3270_v8 = vpop.f32.mrb[20].mxu0  ;;  %v2479_v4 = vpop.permute.xlu0 %2478 }
 0x8e1   : > { %v2401_v10 = vsel %vm792_vm2, %v2389_v5, 0.0  ;;  %v2385_v12 = vadd.f32 %v3270_v8, %v2289_v6  ;;  %v2379_v15 = vpop.f32.mrb[21].mxu0 }
 0x8e2   : > { %v2400_v16 = vsel %vm792_vm2, %v2388_v7, 0.0  ;;  %v2380_v17 = vadd.f32 %v2379_v15, %v2284_v9  ;;  %v2492_v15 = vld [vmem:[%s4143_s16 + $0x10] sm:$0xff] }
 0x8e3   : > { %v2402_v18 = vadd.f32 %v2401_v10, %v2400_v16  ;;  %v2391_v19 = vadd.f32 %v2385_v12, %v3737_v32  ;;  %v2491_v12 = vld [vmem:[%s4143_s16 + $0x8] sm:$0xff]  ;;  %v2493_v16 = vld [vmem:[%s4143_s16 + $0x18] sm:$0xff] }
 0x8e4   : > { %v2390_v20 = vadd.f32 %v2380_v17, %v3735_v31  ;;  %v2494_v17 = vld [vmem:[%s4143_s16 + $0x20] sm:$0xff] }
 0x8e5   : > { %v2405_v21 = vsel %vm792_vm2, %v2391_v19, 0.0 }
 0x8e6   : > { %v2403_v14 = vsel %vm792_vm2, %v2390_v20, 0.0 }
 0x8e7   : > { %v2404_v33 = vadd.f32 %v2403_v14, %v2402_v18  ;;  %v2495_v18 = vld [vmem:[%s4143_s16 + $0x28] sm:$0xff]  ;;  %v2675_v14 = vld [vmem:[%s4145_s18] sm:$0xff] }
 0x8e8   : > { %3307 = vmatprep.mubr.msk.f32.mxu0 %vm694_vm0, %v2675_v14 }
 0x8e9   : > { %v2406_v47 = vadd.f32 %v2405_v21, %v2404_v33  ;;  %v2514_v33 = vpop.permute.xlu1 %2513  ;;  %v2509_v21 = vpop.permute.xlu0 %2508 }
 0x8eb   : > { %v2407_v22 = vrot.slane %v2406_v47, 4 }
 0x8ed   : > { %v2408_v23 = vadd.f32 %v2407_v22, %v2406_v47  ;;  %v2524_v47 = vpop.permute.xlu1 %2523 }
 0x8ef   : > { %v2409_v24 = vrot.slane %v2408_v23, 2 }
 0x8f1   : > { %v2410_v25 = vadd.f32 %v2409_v24, %v2408_v23  ;;  %v2519_v23 = vpop.permute.xlu0 %2518 }
 0x8f3   : > { %v2411_v26 = vrot.slane %v2410_v25, 1 }
 0x8f5   : > { %v2412_v28 = vadd.f32 %v2411_v26, %v2410_v25 }
 0x8f7   : > { %v2413_v29 = vmul.f32 0.03125, %v2412_v28 }
 0x8f9   : > { %v2414_v30 = vsub.f32 %v2388_v7, %v2413_v29  ;;  %v2415_v39 = vsub.f32 %v2389_v5, %v2413_v29  ;;  %v2416_v41 = vsub.f32 %v2390_v20, %v2413_v29  ;;  %v2417_v27 = vsub.f32 %v2391_v19, %v2413_v29  ;;  %v2496_v19 = vld [vmem:[%s4143_s16 + $0x30] sm:$0xff]  ;;  %v2497_v20 = vld [vmem:[%s4143_s16 + $0x38] sm:$0xff] }
 0x8fb   : > { %v2418_v32 = vmul.f32 %v2414_v30, %v2414_v30  ;;  %v2419_v42 = vmul.f32 %v2415_v39, %v2415_v39  ;;  %v2420_v31 = vmul.f32 %v2416_v41, %v2416_v41  ;;  %v2421_v43 = vmul.f32 %v2417_v27, %v2417_v27 }
 0x8fd   : > { %v2422_v44 = vsel %vm792_vm2, %v2418_v32, 0.0  ;;  %v2423_v45 = vsel %vm792_vm2, %v2419_v42, 0.0  ;;  %v2425_v35 = vsel %vm792_vm2, %v2420_v31, 0.0  ;;  %v2427_v37 = vsel %vm792_vm2, %v2421_v43, 0.0  ;;  %v2534_v32 = vpop.permute.xlu1 %2533  ;;  %v2529_v43 = vpop.permute.xlu0 %2528 }
 0x8fe   : > { %v2424_v46 = vadd.f32 %v2423_v45, %v2422_v44 }
 0x900   : > { %v2426_v36 = vadd.f32 %v2425_v35, %v2424_v46 }
 0x902   : > { %v2428_v38 = vadd.f32 %v2427_v37, %v2426_v36 }
 0x904   : > { %v2429_v48 = vrot.slane %v2428_v38, 4 }
 0x906   : > { %v2430_v49 = vadd.f32 %v2429_v48, %v2428_v38 }
 0x908   : > { %v2431_v50 = vrot.slane %v2430_v49, 2 }
 0x90a   : > { %v2432_v51 = vadd.f32 %v2431_v50, %v2430_v49 }
 0x90c   : > { %v2433_v52 = vrot.slane %v2432_v51, 1 }
 0x90e   : > { %v2434_v53 = vadd.f32 %v2433_v52, %v2432_v51 }
 0x910   : > { %v2435_v56 = vmul.f32 0.03125, %v2434_v53 }
 0x912   : > { %v2436_v13 = vadd.f32 1e-05, %v2435_v56  ;;  %v2544_v56 = vpop.permute.xlu1 %2543 }
 0x914   : > { %3467 = vrsqrt.f32 %v2436_v13 }
 0x91e   : > { %v3468_v60 = vpop.eup %3467 }
 0x91f   : > { %v2440_v11 = vmul.f32 %v3468_v60, %v2416_v41  ;;  %v2438_v40 = vmul.f32 %v3468_v60, %v2414_v30  ;;  %v2439_v61 = vmul.f32 %v3468_v60, %v2415_v39  ;;  %v2441_v62 = vmul.f32 %v3468_v60, %v2417_v27 }
 0x921   : > { %v2462_v63 = vmul.f32 %v2445_v55, %v2438_v40  ;;  %v2463_v0 = vmul.f32 %v2450_v54, %v2439_v61  ;;  %v2464_v1 = vmul.f32 %v2455_v59, %v2440_v11  ;;  %v2465_v2 = vmul.f32 %v2460_v58, %v2441_v62  ;;  %v2539_v59 = vpop.permute.xlu0 %2538 }
 0x923   : > { %v4007_v5 = vadd.f32 %v2469_v57, %v2462_v63  ;;  %v4009_v6 = vadd.f32 %v2474_v34, %v2463_v0  ;;  %v4011_v7 = vadd.f32 %v2479_v4, %v2464_v1  ;;  %v4013_v8 = vadd.f32 %v2484_v3, %v2465_v2 }
 0x925   : > { %v3393_v9 = vpack.c.bf16 %v4009_v6, %v4007_v5  ;;  %v3397_v10 = vpack.c.bf16 %v4013_v8, %v4011_v7 }
 0x927   : > { %3394 = vmatprep.subr.bf16.mxu1 %v3393_v9 }
 0x928   : > { %3396 = vmatpush3.bf16.msra.mxu1 %v3393_v9 }
 0x929   : > { %3398 = vmatprep.subr.bf16.mxu1 %v3397_v10 }
 0x92c   : > { %3400 = vmatpush3.bf16.msra.mxu1 %v3397_v10 }
 0x92f   : > { %3280 = vmatmul.mubr.msk.f32.vlgmr.msra.gmra.mrb[18].mxu1 %vm1054_vm1, %v2491_v12 }
 0x930   : > { %3282 = vmatprep.mubr.msk.f32.mxu1 %vm1054_vm1, %v2492_v15 }
 0x933   : > { %3283 = vmatmul.mubr.msk.f32.gmra.mrb[20].mxu1 %vm1054_vm1, %v2493_v16 }
 0x934   : > { %3285 = vmatprep.mubr.msk.f32.mxu1 %vm1054_vm1, %v2494_v17 }
 0x937   : > { %3286 = vmatmul.mubr.msk.f32.gmra.mrb[22].mxu1 %vm1054_vm1, %v2495_v18 }
 0x938   : > { %3288 = vmatprep.mubr.msk.f32.mxu1 %vm1054_vm1, %v2496_v19 }
 0x93b   : > { %3289 = vmatmul.mubr.msk.f32.gmra.mrb[24].mxu1 %vm1054_vm1, %v2497_v20 }
 0xa02   : > { %v3281_v22 = vpop.f32.mrb[18].mxu1 }
 0xa03   : > { %v4051_v24 = vadd.f32 %v3281_v22, %v2514_v33  ;;  %v2636_v25 = vpop.f32.mrb[19].mxu1 }
 0xa04   : > { %v4053_v26 = vadd.f32 %v2636_v25, %v2509_v21 }
 0xa05   : > { %v2688_v28 = vmul.f32 0.044715, %v4051_v24  ;;  %v2680_v25 = vmul.f32 0.5, %v4051_v24 }
 0xa06   : > { %v2687_v29 = vmul.f32 0.044715, %v4053_v26  ;;  %v3284_v30 = vpop.f32.mrb[20].mxu1 }
 0xa07   : > { %v2696_v39 = vmul.f32 %v2688_v28, %v4051_v24  ;;  %v4058_v41 = vadd.f32 %v3284_v30, %v2524_v47  ;;  %v2646_v27 = vpop.f32.mrb[21].mxu1  ;;  %v2679_v30 = vmul.f32 0.5, %v4053_v26 }
 0xa08   : > { %v2695_v42 = vmul.f32 %v2687_v29, %v4053_v26  ;;  %v4061_v31 = vadd.f32 %v2646_v27, %v2519_v23 }
 0xa09   : > { %v2704_v44 = vmul.f32 %v2696_v39, %v4051_v24  ;;  %v2690_v45 = vmul.f32 0.044715, %v4058_v41 }
 0xa0a   : > { %v2703_v46 = vmul.f32 %v2695_v42, %v4053_v26  ;;  %v2689_v35 = vmul.f32 0.044715, %v4061_v31  ;;  %v3287_v36 = vpop.f32.mrb[22].mxu1 }
 0xa0b   : > { %v2698_v37 = vmul.f32 %v2690_v45, %v4058_v41  ;;  %v4068_v38 = vadd.f32 %v3287_v36, %v2534_v32  ;;  %v2656_v48 = vpop.f32.mrb[23].mxu1  ;;  %v2712_v49 = vadd.f32 %v2704_v44, %v4051_v24  ;;  %v2682_v44 = vmul.f32 0.5, %v4058_v41 }
 0xa0c   : > { %v2697_v50 = vmul.f32 %v2689_v35, %v4061_v31  ;;  %v4072_v51 = vadd.f32 %v2656_v48, %v2529_v43  ;;  %v2711_v52 = vadd.f32 %v2703_v46, %v4053_v26  ;;  %v2681_v35 = vmul.f32 0.5, %v4061_v31 }
 0xa0d   : > { %v2706_v53 = vmul.f32 %v2698_v37, %v4058_v41  ;;  %v2692_v54 = vmul.f32 0.044715, %v4068_v38  ;;  %v2720_v55 = vmul.f32 0.7978846, %v2712_v49  ;;  %v2684_v26 = vmul.f32 0.5, %v4068_v38 }
 0xa0e   : > { %v2705_v13 = vmul.f32 %v2697_v50, %v4061_v31  ;;  %v2691_v34 = vmul.f32 0.044715, %v4072_v51  ;;  %v3290_v57 = vpop.f32.mrb[24].mxu1  ;;  %v2719_v58 = vmul.f32 0.7978846, %v2711_v52 }
 0xa0f   : > { %v2700_v60 = vmul.f32 %v2692_v54, %v4068_v38  ;;  %v4080_v11 = vadd.f32 %v3290_v57, %v2544_v56  ;;  %v2666_v40 = vpop.f32.mrb[25].mxu1  ;;  %3469 = vtanh.f32 %v2720_v55  ;;  %v2714_v61 = vadd.f32 %v2706_v53, %v4058_v41 }
 0xa10   : > { %v2699_v62 = vmul.f32 %v2691_v34, %v4072_v51  ;;  %v2667_v63 = vadd.f32 %v2666_v40, %v2539_v59  ;;  %3471 = vtanh.f32 %v2719_v58  ;;  %v2713_v0 = vadd.f32 %v2705_v13, %v4061_v31 }
 0xa11   : > { %v2708_v1 = vmul.f32 %v2700_v60, %v4068_v38  ;;  %v2694_v2 = vmul.f32 0.044715, %v4080_v11  ;;  %v2722_v3 = vmul.f32 0.7978846, %v2714_v61  ;;  %v2683_v53 = vmul.f32 0.5, %v4072_v51  ;;  %v2678_v61 = vld [vmem:[%s4145_s18 + $0x18] sm:$0xff] }
 0xa12   : > { %v2707_v4 = vmul.f32 %v2699_v62, %v4072_v51  ;;  %v2693_v9 = vmul.f32 0.044715, %v2667_v63  ;;  %v2721_v10 = vmul.f32 0.7978846, %v2713_v0  ;;  %v2686_v31 = vmul.f32 0.5, %v4080_v11  ;;  %v2763_v62 = vpop.permute.xlu1 %2762 }
 0xa13   : > { %v2702_v12 = vmul.f32 %v2694_v2, %v4080_v11  ;;  %3473 = vtanh.f32 %v2722_v3  ;;  %v2716_v15 = vadd.f32 %v2708_v1, %v4068_v38  ;;  %v2685_v58 = vmul.f32 0.5, %v2667_v63 }
 0xa14   : > { %v2701_v16 = vmul.f32 %v2693_v9, %v2667_v63  ;;  %3475 = vtanh.f32 %v2721_v10  ;;  %v2715_v17 = vadd.f32 %v2707_v4, %v4072_v51  ;;  %v2676_v51 = vld [vmem:[%s4145_s18 + $0x8] sm:$0xff] }
 0xa15   : > { %v2710_v18 = vmul.f32 %v2702_v12, %v4080_v11  ;;  %v2724_v19 = vmul.f32 0.7978846, %v2716_v15 }
 0xa16   : > { %v2709_v20 = vmul.f32 %v2701_v16, %v2667_v63  ;;  %v2723_v14 = vmul.f32 0.7978846, %v2715_v17  ;;  %v2773_v9 = vpop.permute.xlu1 %2772 }
 0xa17   : > { %3477 = vtanh.f32 %v2724_v19  ;;  %v2718_v33 = vadd.f32 %v2710_v18, %v4080_v11  ;;  %v2677_v11 = vld [vmem:[%s4145_s18 + $0x10] sm:$0xff] }
 0xa18   : > { %3479 = vtanh.f32 %v2723_v14  ;;  %v2717_v21 = vadd.f32 %v2709_v20, %v2667_v63  ;;  %v2758_v63 = vpop.permute.xlu0 %2757 }
 0xa19   : > { %v3470_v47 = vpop.eup %3469  ;;  %v2726_v22 = vmul.f32 0.7978846, %v2718_v33 }
 0xa1a   : > { %v3472_v23 = vpop.eup %3471  ;;  %v2736_v28 = vadd.f32 1.0, %v3470_v47  ;;  %v2725_v29 = vmul.f32 0.7978846, %v2717_v21 }
 0xa1b   : > { %v2735_v39 = vadd.f32 1.0, %v3472_v23  ;;  %3481 = vtanh.f32 %v2726_v22 }
 0xa1c   : > { %v2744_v27 = vmul.f32 %v2736_v28, %v2680_v25  ;;  %3483 = vtanh.f32 %v2725_v29  ;;  %v2768_v15 = vpop.permute.xlu0 %2767 }
 0xa1d   : > { %v3474_v32 = vpop.eup %3473  ;;  %v2743_v42 = vmul.f32 %v2735_v39, %v2679_v30 }
 0xa1e   : > { %v3476_v43 = vpop.eup %3475  ;;  %v2738_v45 = vadd.f32 1.0, %v3474_v32 }
 0xa1f   : > { %v3401_v46 = vpack.c.bf16 %v2744_v27, %v2743_v42  ;;  %v2737_v36 = vadd.f32 1.0, %v3476_v43 }
 0xa20   : > { %v2746_v37 = vmul.f32 %v2738_v45, %v2682_v44 }
 0xa21   : > { %v3478_v24 = vpop.eup %3477  ;;  %3402 = vmatprep.subr.bf16.mxu0 %v3401_v46  ;;  %v2745_v48 = vmul.f32 %v2737_v36, %v2681_v35 }
 0xa22   : > { %v3480_v49 = vpop.eup %3479  ;;  %3404 = vmatpush3.bf16.msra.mxu0 %v3401_v46  ;;  %v2740_v50 = vadd.f32 1.0, %v3478_v24 }
 0xa23   : > { %v3405_v52 = vpack.c.bf16 %v2746_v37, %v2745_v48  ;;  %v2739_v54 = vadd.f32 1.0, %v3480_v49 }
 0xa24   : > { %v2748_v55 = vmul.f32 %v2740_v50, %v2684_v26 }
 0xa25   : > { %v3482_v41 = vpop.eup %3481  ;;  %3406 = vmatprep.subr.bf16.mxu0 %v3405_v52  ;;  %v2747_v56 = vmul.f32 %v2739_v54, %v2683_v53 }
 0xa26   : > { %v3484_v13 = vpop.eup %3483  ;;  %3408 = vmatpush3.bf16.msra.mxu0 %v3405_v52  ;;  %v2742_v34 = vadd.f32 1.0, %v3482_v41 }
 0xa27   : > { %v3409_v57 = vpack.c.bf16 %v2748_v55, %v2747_v56  ;;  %v2741_v59 = vadd.f32 1.0, %v3484_v13 }
 0xa28   : > { %v2750_v60 = vmul.f32 %v2742_v34, %v2686_v31 }
 0xa29   : > { %3410 = vmatprep.subr.bf16.mxu0 %v3409_v57  ;;  %v2749_v38 = vmul.f32 %v2741_v59, %v2685_v58 }
 0xa2a   : > { %3412 = vmatpush3.bf16.msra.mxu0 %v3409_v57 }
 0xa2b   : > { %v3413_v40 = vpack.c.bf16 %v2750_v60, %v2749_v38 }
 0xa2d   : > { %3414 = vmatprep.subr.bf16.mxu0 %v3413_v40 }
 0xa2e   : > { %3416 = vmatpush3.bf16.msra.mxu0 %v3413_v40 }
 0xa31   : > { %3308 = vmatmul.mubr.msk.f32.vlgmr.msra.gmra.mrb[22].mxu0 %vm694_vm0, %v2676_v51 }
 0xa32   : > { %3310 = vmatprep.mubr.msk.f32.mxu0 %vm694_vm0, %v2677_v11 }
 0xa35   : > { %3311 = vmatmul.mubr.msk.f32.gmra.mrb[24].mxu0 %vm694_vm0, %v2678_v61 }
 0xb04   : > { %v3309_v0 = vpop.f32.mrb[22].mxu0 }
 0xb05   : > { %v2859_v1 = vadd.f32 %v3309_v0, %v2763_v62  ;;  %v2853_v2 = vpop.f32.mrb[23].mxu0 }
 0xb06   : > { %v2854_v3 = vadd.f32 %v2853_v2, %v2758_v63 }
 0xb07   : > { %v2873_v4 = vadd.f32 %v2859_v1, %v4009_v6 }
 0xb08   : > { %v2872_v10 = vadd.f32 %v2854_v3, %v4007_v5  ;;  %v3312_v12 = vpop.f32.mrb[24].mxu0 }
 0xb09   : > { %2877 = vst.msk [vmem:[%s649_s20 + $0x8] sm:$0xff] %vm792_vm2, %v2873_v4  ;;  %v2869_v16 = vadd.f32 %v3312_v12, %v2773_v9  ;;  %v2863_v17 = vpop.f32.mrb[25].mxu0 }
 0xb0a   : > { %2876 = vst.msk [vmem:[%s649_s20] sm:$0xff] %vm792_vm2, %v2872_v10  ;;  %v2864_v18 = vadd.f32 %v2863_v17, %v2768_v15 }
 0xb0b   : > { %v2875_v19 = vadd.f32 %v2869_v16, %v4013_v8 }
 0xb0c   : > { %v2874_v20 = vadd.f32 %v2864_v18, %v4011_v7 }
 0xb0d   : > { %2879 = vst.msk [vmem:[%s649_s20 + $0x18] sm:$0xff] %vm792_vm2, %v2875_v19 }
 0xb0e   : > { %2878 = vst.msk [vmem:[%s649_s20 + $0x10] sm:$0xff] %vm792_vm2, %v2874_v20 }
 0xb0f PF: > { %s4168_s22 = sld [smem:[#allocation2_spill]] }
 0xb15   : > { %s30_s1 = sadd.s32 1, %s4168_s22  }
 0xb16   : > { %p27_p4 = scmp.ge.s32.totalorder %s30_s1, 4  }
 0xb18   :  { %29 = sbr.rel (!%p27_p4) target bundleno = 7 (0x7), region = 133 }

</bundles_post_ra>
